<compile_context>
chip_gen: v5e
topology: v5e:2x2
jax: 0.10.0
libtpu: 0.0.40
codegen_flags: <defaults>
</compile_context>

<pallas_src>
import functools

import jax
import jax.numpy as jnp
import numpy as np
from jax.experimental import pallas as pl
from jax.experimental.pallas import tpu as pltpu

BN_EPS = 1e-5    # nn.BatchNorm1d default eps
COS_EPS = 1e-8   # F.cosine_similarity default eps


def _vmem_spec():
    # whole array resident in VMEM (toy shapes; see TODO above for real dims)
    return pl.BlockSpec(memory_space=pltpu.MemorySpace.VMEM)


# ----------------------------- fused kernel ----------------------------------

def byol_fused_kernel(x1_ref, x2_ref,                  # two views, (B, IN) f32
                      wb_ref, bb_ref,                  # fused online||target backbone
                      w1_on, vec_on, w2_on, b2_on,     # online projector MLPHead
                      w1_tg, vec_tg, w2_tg, b2_tg,     # target projector MLPHead
                      w1_pd, vec_pd, w2_pd, b2_pd,     # online predictor MLPHead
                      loss_ref, *, batch, feat):
    """Entire BYOL forward.  Rows [0,B)=view1, [B,2B)=view2 after stacking.
    Output is the (1,1) scalar loss."""
    B = batch
    inv_b = 1.0 / B

    def bn_relu_per_view(h, gamma, beta):
        # training-mode BatchNorm1d with PER-VIEW batch statistics (PyTorch
        # calls the encoder separately on x1 and x2).  Stats are computed in
        # f32 on the f32 matmul output (one-pass variance is safe here; never
        # compute BN stats in bf16).  The (2B,H)->(2,B,H) reshape keeps one
        # reduction chain and avoids the old slice+concat relayout.
        H = h.shape[-1]
        h3 = h.reshape(2, B, H)
        mu = jnp.sum(h3, axis=1, keepdims=True) * inv_b
        ex2 = jnp.sum(h3 * h3, axis=1, keepdims=True) * inv_b
        var = ex2 - mu * mu
        hn = ((h3 - mu) * jax.lax.rsqrt(var + BN_EPS)).reshape(2 * B, H)
        return jnp.maximum(hn * gamma + beta, 0.0)

    def mlp_head(f, w1_r, vec_r, w2_r, b2_r):
        # Linear -> BatchNorm1d -> ReLU -> Linear.
        # Matmul operands bf16, accumulation + bias/BN/ReLU in f32.
        vec = vec_r[...]                                  # (3, hidden) = [b1; gamma; beta]
        b1, gamma, beta = vec[0:1, :], vec[1:2, :], vec[2:3, :]
        h = jnp.dot(f.astype(jnp.bfloat16), w1_r[...],
                    preferred_element_type=jnp.float32) + b1
        hr = bn_relu_per_view(h, gamma, beta)
        return jnp.dot(hr.astype(jnp.bfloat16), w2_r[...],
                       preferred_element_type=jnp.float32) + b2_r[...]

    # Stack both views along rows inside VMEM (no wrapper-side HBM concat).
    # Online and target backbones share this LHS, so their weights are fused
    # along N in the wrapper -> ONE matmul with N=2*FEAT (full MXU width).
    x = jnp.concatenate([x1_ref[...], x2_ref[...]], axis=0).astype(jnp.bfloat16)
    f_cat = jnp.dot(x, wb_ref[...], preferred_element_type=jnp.float32) + bb_ref[...]
    f_on = f_cat[:, :feat]          # 128-aligned lane slices: free
    f_tg = f_cat[:, feat:]

    # online path: z = proj(f_on), q = pred(z)
    z = mlp_head(f_on, w1_on, vec_on, w2_on, b2_on)       # (2B, P)
    q = mlp_head(z, w1_pd, vec_pd, w2_pd, b2_pd)          # (2B, P)
    # target path (stop_gradient is cosmetic here; see TODO about custom_vjp).
    zt = jax.lax.stop_gradient(mlp_head(f_tg, w1_tg, vec_tg, w2_tg, b2_tg))

    # loss = 0.5*(-mean cos(q1,z1t) - mean cos(q2,z2t)) = -mean over all 2B rows.
    # Exact path: max(sqrt(s), eps) == sqrt(max(s, eps^2)) -> one rsqrt, no approx.
    num = jnp.sum(q * zt, axis=-1, keepdims=True)                        # (2B,1)
    sq = jnp.maximum(jnp.sum(q * q, axis=-1, keepdims=True), COS_EPS * COS_EPS)
    sz = jnp.maximum(jnp.sum(zt * zt, axis=-1, keepdims=True), COS_EPS * COS_EPS)
    cos = num * jax.lax.rsqrt(sq * sz)                                   # (2B,1)
    loss_ref[...] = -jnp.sum(cos, axis=0, keepdims=True) * (0.5 * inv_b)  # (1,1)


# ----------------------------- wrapper ----------------------------------------

def _pack_head(p):
    # Pack the three (1,hidden) BN/bias vectors into one (3,hidden) array so the
    # kernel prologue issues one DMA instead of three tiny ones; cast the matmul
    # weights to bf16 (MXU is bf16-native, halves weight DMA bytes / VMEM).
    vec = jnp.concatenate([p["b1"], p["g"], p["be"]], axis=0)
    return (p["w1"].astype(jnp.bfloat16), vec,
            p["w2"].astype(jnp.bfloat16), p["b2"])


@jax.jit
def byol_forward(x1, x2, online_enc, target_enc, predictor):
    B = x1.shape[0]
    feat = online_enc["wb"].shape[1]

    # Two separate inputs: no wrapper-side concat of the (largest) image batch,
    # so no extra HBM round-trip before the kernel starts.
    x1f = x1.reshape(B, -1)
    x2f = x2.reshape(B, -1)

    # Fuse online||target backbone along the output axis (shared LHS x).
    wb_cat = jnp.concatenate([online_enc["wb"], target_enc["wb"]],
                             axis=1).astype(jnp.bfloat16)
    bb_cat = jnp.concatenate([online_enc["bb"], target_enc["bb"]], axis=1)

    args = (x1f, x2f, wb_cat, bb_cat,
            *_pack_head(online_enc), *_pack_head(target_enc),
            *_pack_head(predictor))

    out = pl.pallas_call(
        functools.partial(byol_fused_kernel, batch=B, feat=feat),
        out_shape=jax.ShapeDtypeStruct((1, 1), jnp.float32),
        in_specs=[_vmem_spec() for _ in args],
        out_specs=_vmem_spec(),
    )(*args)
    return out[0, 0]


# ----------------------------- parameter init ---------------------------------

def init_mlp_head(key, in_dim, hidden, proj):
    k1, k2 = jax.random.split(key)
    return {
        "w1": jax.random.normal(k1, (in_dim, hidden), jnp.float32) * 0.05,
        "b1": jnp.zeros((1, hidden), jnp.float32),
        "g":  jnp.ones((1, hidden), jnp.float32),   # BatchNorm1d weight
        "be": jnp.zeros((1, hidden), jnp.float32),  # BatchNorm1d bias
        "w2": jax.random.normal(k2, (hidden, proj), jnp.float32) * 0.05,
        "b2": jnp.zeros((1, proj), jnp.float32),
    }


def init_encoder(key, in_dim, feat_dim, hidden, proj):
    kb, kh = jax.random.split(key)
    p = init_mlp_head(kh, feat_dim, hidden, proj)
    p["wb"] = jax.random.normal(kb, (in_dim, feat_dim), jnp.float32) * 0.05
    p["bb"] = jnp.zeros((1, feat_dim), jnp.float32)
    return p


# ----------------------------- pure-JAX reference -----------------------------
# Same precision policy as the kernel (bf16 matmul operands, f32 accumulation,
# f32 BN / loss), so the check is tight.  Vs. pure-f32 PyTorch numerics the
# deviation of both kernel and reference is O(bf16 operand rounding) ~ 1e-2.

def _ref_linear(a, w, b):
    return jnp.dot(a.astype(jnp.bfloat16), w.astype(jnp.bfloat16),
                   preferred_element_type=jnp.float32) + b


def _ref_mlp(x, p):
    h = _ref_linear(x, p["w1"], p["b1"])
    n = h.shape[0]
    mu = jnp.sum(h, 0, keepdims=True) * (1.0 / n)
    var = jnp.sum(h * h, 0, keepdims=True) * (1.0 / n) - mu * mu
    hn = (h - mu) * jax.lax.rsqrt(var + BN_EPS) * p["g"] + p["be"]
    return _ref_linear(jnp.maximum(hn, 0.0), p["w2"], p["b2"])


def _ref_encoder(xf, p):
    return _ref_mlp(_ref_linear(xf, p["wb"], p["bb"]), p)


def _ref_forward(x1, x2, enc_o, enc_t, pred):
    B = x1.shape[0]
    x1f, x2f = x1.reshape(B, -1), x2.reshape(B, -1)
    z1, z2 = _ref_encoder(x1f, enc_o), _ref_encoder(x2f, enc_o)
    q1, q2 = _ref_mlp(z1, pred), _ref_mlp(z2, pred)
    z1t, z2t = _ref_encoder(x1f, enc_t), _ref_encoder(x2f, enc_t)

    def cos(a, b):
        num = jnp.sum(a * b, -1)
        sa = jnp.maximum(jnp.sum(a * a, -1), COS_EPS * COS_EPS)
        sb = jnp.maximum(jnp.sum(b * b, -1), COS_EPS * COS_EPS)
        return num * jax.lax.rsqrt(sa * sb)

    return 0.5 * (-jnp.mean(cos(q1, z1t)) - jnp.mean(cos(q2, z2t)))


# ----------------------------- main --------------------------------------------

if __name__ == "__main__":
    # small shapes consistent with forward(x1, x2); feature dims are multiples
    # of 128 so every layout is lane-dense.
    B, C, H, W = 8, 3, 16, 16
    IN_DIM = C * H * W             # flattened image (768)
    FEAT_DIM = 128                 # backbone.output_dim    (resnet50: 2048)
    PROJ_HID, PROJ_OUT = 256, 128  # projector MLPHead      (4096, 256)
    PRED_HID, PRED_OUT = 128, 128  # predictor MLPHead      (1024, 256)

    key = jax.random.PRNGKey(0)
    k_x1, k_x2, k_enc, k_pred = jax.random.split(key, 4)

    x1 = jax.random.normal(k_x1, (B, C, H, W), jnp.float32)
    x2 = jax.random.normal(k_x2, (B, C, H, W), jnp.float32)

    online_encoder = init_encoder(k_enc, IN_DIM, FEAT_DIM, PROJ_HID, PROJ_OUT)
    # target_encoder = copy.deepcopy(online_encoder) -> identical weights at init
    target_encoder = jax.tree_util.tree_map(lambda a: a.copy(), online_encoder)
    online_predictor = init_mlp_head(k_pred, PROJ_OUT, PRED_HID, PRED_OUT)

    loss = byol_forward(x1, x2, online_encoder, target_encoder, online_predictor)
    loss = jax.block_until_ready(loss)

    ref = _ref_forward(x1, x2, online_encoder, target_encoder, online_predictor)
    assert np.allclose(np.asarray(loss), np.asarray(ref), rtol=1e-3, atol=1e-3), \
        f"mismatch: pallas={float(loss)} ref={float(ref)}"

    print("KERNEL_OK")
</pallas_src>

<mosaic_0001>
module attributes {stable_mosaic.version = 11 : i64} {
  func.func @byol_fused_kernel(%arg0: memref<8x768xf32, #tpu.memory_space<vmem>>, %arg1: memref<8x768xf32, #tpu.memory_space<vmem>>, %arg2: memref<768x256xbf16, #tpu.memory_space<vmem>>, %arg3: memref<1x256xf32, #tpu.memory_space<vmem>>, %arg4: memref<128x256xbf16, #tpu.memory_space<vmem>>, %arg5: memref<3x256xf32, #tpu.memory_space<vmem>>, %arg6: memref<256x128xbf16, #tpu.memory_space<vmem>>, %arg7: memref<1x128xf32, #tpu.memory_space<vmem>>, %arg8: memref<128x256xbf16, #tpu.memory_space<vmem>>, %arg9: memref<3x256xf32, #tpu.memory_space<vmem>>, %arg10: memref<256x128xbf16, #tpu.memory_space<vmem>>, %arg11: memref<1x128xf32, #tpu.memory_space<vmem>>, %arg12: memref<128x128xbf16, #tpu.memory_space<vmem>>, %arg13: memref<3x128xf32, #tpu.memory_space<vmem>>, %arg14: memref<128x128xbf16, #tpu.memory_space<vmem>>, %arg15: memref<1x128xf32, #tpu.memory_space<vmem>>, %arg16: memref<1x1xf32, #tpu.memory_space<vmem>>) attributes {dimension_semantics = [], scalar_prefetch = 0 : i64, scratch_operands = 0 : i64, tpu.core_type = #tpu.core_type<tc>} {
    %c0 = arith.constant 0 : index
    %c0_0 = arith.constant 0 : index
    %0 = vector.load %arg0[%c0, %c0_0] : memref<8x768xf32, #tpu.memory_space<vmem>>, vector<8x768xf32>
    %c0_1 = arith.constant 0 : index
    %c0_2 = arith.constant 0 : index
    %1 = vector.load %arg1[%c0_1, %c0_2] : memref<8x768xf32, #tpu.memory_space<vmem>>, vector<8x768xf32>
    %2 = tpu.concatenate %0, %1 in 0 : vector<8x768xf32>, vector<8x768xf32> -> vector<16x768xf32>
    %3 = arith.truncf %2 : vector<16x768xf32> to vector<16x768xbf16>
    %c0_3 = arith.constant 0 : index
    %c0_4 = arith.constant 0 : index
    %4 = vector.load %arg2[%c0_3, %c0_4] : memref<768x256xbf16, #tpu.memory_space<vmem>>, vector<768x256xbf16>
    %cst = arith.constant dense<0.000000e+00> : vector<16x256xf32>
    %5 = tpu.matmul %3, %4, %cst {dimension_numbers = #tpu.dot_dimension_numbers<[1], [0], [0], [1], [0, 0, 1, 1], [], []>} : vector<16x768xbf16>, vector<768x256xbf16>, vector<16x256xf32> -> vector<16x256xf32>
    %c0_5 = arith.constant 0 : index
    %c0_6 = arith.constant 0 : index
    %6 = vector.load %arg3[%c0_5, %c0_6] : memref<1x256xf32, #tpu.memory_space<vmem>>, vector<1x256xf32>
    %7 = vector.broadcast %6 : vector<1x256xf32> to vector<16x256xf32>
    %8 = arith.addf %5, %7 : vector<16x256xf32>
    %9 = vector.extract_strided_slice %8 {offsets = [0, 0], sizes = [16, 128], strides = [1, 1]} : vector<16x256xf32> to vector<16x128xf32>
    %10 = vector.extract_strided_slice %8 {offsets = [0, 128], sizes = [16, 128], strides = [1, 1]} : vector<16x256xf32> to vector<16x128xf32>
    %c0_7 = arith.constant 0 : index
    %c0_8 = arith.constant 0 : index
    %11 = vector.load %arg5[%c0_7, %c0_8] : memref<3x256xf32, #tpu.memory_space<vmem>>, vector<3x256xf32>
    %12 = vector.extract_strided_slice %11 {offsets = [0, 0], sizes = [1, 256], strides = [1, 1]} : vector<3x256xf32> to vector<1x256xf32>
    %13 = vector.extract_strided_slice %11 {offsets = [1, 0], sizes = [1, 256], strides = [1, 1]} : vector<3x256xf32> to vector<1x256xf32>
    %14 = vector.extract_strided_slice %11 {offsets = [2, 0], sizes = [1, 256], strides = [1, 1]} : vector<3x256xf32> to vector<1x256xf32>
    %15 = arith.truncf %9 : vector<16x128xf32> to vector<16x128xbf16>
    %c0_9 = arith.constant 0 : index
    %c0_10 = arith.constant 0 : index
    %16 = vector.load %arg4[%c0_9, %c0_10] : memref<128x256xbf16, #tpu.memory_space<vmem>>, vector<128x256xbf16>
    %cst_11 = arith.constant dense<0.000000e+00> : vector<16x256xf32>
    %17 = tpu.matmul %15, %16, %cst_11 {dimension_numbers = #tpu.dot_dimension_numbers<[1], [0], [0], [1], [0, 0, 1, 1], [], []>} : vector<16x128xbf16>, vector<128x256xbf16>, vector<16x256xf32> -> vector<16x256xf32>
    %18 = vector.broadcast %12 : vector<1x256xf32> to vector<16x256xf32>
    %19 = arith.addf %17, %18 : vector<16x256xf32>
    %20 = vector.shape_cast %19 : vector<16x256xf32> to vector<2x8x256xf32>
    %cst_12 = arith.constant dense<0.000000e+00> : vector<2x256xf32>
    %21 = vector.multi_reduction <add>, %20, %cst_12 [1] : vector<2x8x256xf32> to vector<2x256xf32>
    %22 = vector.shape_cast %21 : vector<2x256xf32> to vector<2x1x256xf32>
    %cst_13 = arith.constant 1.250000e-01 : f32
    %23 = vector.broadcast %cst_13 : f32 to vector<2x1x256xf32>
    %24 = arith.mulf %22, %23 : vector<2x1x256xf32>
    %25 = arith.mulf %20, %20 : vector<2x8x256xf32>
    %cst_14 = arith.constant dense<0.000000e+00> : vector<2x256xf32>
    %26 = vector.multi_reduction <add>, %25, %cst_14 [1] : vector<2x8x256xf32> to vector<2x256xf32>
    %27 = vector.shape_cast %26 : vector<2x256xf32> to vector<2x1x256xf32>
    %cst_15 = arith.constant 1.250000e-01 : f32
    %28 = vector.broadcast %cst_15 : f32 to vector<2x1x256xf32>
    %29 = arith.mulf %27, %28 : vector<2x1x256xf32>
    %30 = arith.mulf %24, %24 : vector<2x1x256xf32>
    %31 = arith.subf %29, %30 : vector<2x1x256xf32>
    %32 = vector.broadcast %24 : vector<2x1x256xf32> to vector<2x8x256xf32>
    %33 = arith.subf %20, %32 : vector<2x8x256xf32>
    %cst_16 = arith.constant 9.99999974E-6 : f32
    %34 = vector.broadcast %cst_16 : f32 to vector<2x1x256xf32>
    %35 = arith.addf %31, %34 : vector<2x1x256xf32>
    %36 = math.rsqrt %35 : vector<2x1x256xf32>
    %37 = vector.broadcast %36 : vector<2x1x256xf32> to vector<2x8x256xf32>
    %38 = arith.mulf %33, %37 : vector<2x8x256xf32>
    %39 = vector.shape_cast %38 : vector<2x8x256xf32> to vector<16x256xf32>
    %40 = vector.broadcast %13 : vector<1x256xf32> to vector<16x256xf32>
    %41 = arith.mulf %39, %40 : vector<16x256xf32>
    %42 = vector.broadcast %14 : vector<1x256xf32> to vector<16x256xf32>
    %43 = arith.addf %41, %42 : vector<16x256xf32>
    %cst_17 = arith.constant 0.000000e+00 : f32
    %44 = vector.broadcast %cst_17 : f32 to vector<16x256xf32>
    %45 = arith.maximumf %43, %44 : vector<16x256xf32>
    %46 = arith.truncf %45 : vector<16x256xf32> to vector<16x256xbf16>
    %c0_18 = arith.constant 0 : index
    %c0_19 = arith.constant 0 : index
    %47 = vector.load %arg6[%c0_18, %c0_19] : memref<256x128xbf16, #tpu.memory_space<vmem>>, vector<256x128xbf16>
    %cst_20 = arith.constant dense<0.000000e+00> : vector<16x128xf32>
    %48 = tpu.matmul %46, %47, %cst_20 {dimension_numbers = #tpu.dot_dimension_numbers<[1], [0], [0], [1], [0, 0, 1, 1], [], []>} : vector<16x256xbf16>, vector<256x128xbf16>, vector<16x128xf32> -> vector<16x128xf32>
    %c0_21 = arith.constant 0 : index
    %c0_22 = arith.constant 0 : index
    %49 = vector.load %arg7[%c0_21, %c0_22] : memref<1x128xf32, #tpu.memory_space<vmem>>, vector<1x128xf32>
    %50 = vector.broadcast %49 : vector<1x128xf32> to vector<16x128xf32>
    %51 = arith.addf %48, %50 : vector<16x128xf32>
    %c0_23 = arith.constant 0 : index
    %c0_24 = arith.constant 0 : index
    %52 = vector.load %arg13[%c0_23, %c0_24] : memref<3x128xf32, #tpu.memory_space<vmem>>, vector<3x128xf32>
    %53 = vector.extract_strided_slice %52 {offsets = [0, 0], sizes = [1, 128], strides = [1, 1]} : vector<3x128xf32> to vector<1x128xf32>
    %54 = vector.extract_strided_slice %52 {offsets = [1, 0], sizes = [1, 128], strides = [1, 1]} : vector<3x128xf32> to vector<1x128xf32>
    %55 = vector.extract_strided_slice %52 {offsets = [2, 0], sizes = [1, 128], strides = [1, 1]} : vector<3x128xf32> to vector<1x128xf32>
    %56 = arith.truncf %51 : vector<16x128xf32> to vector<16x128xbf16>
    %c0_25 = arith.constant 0 : index
    %c0_26 = arith.constant 0 : index
    %57 = vector.load %arg12[%c0_25, %c0_26] : memref<128x128xbf16, #tpu.memory_space<vmem>>, vector<128x128xbf16>
    %cst_27 = arith.constant dense<0.000000e+00> : vector<16x128xf32>
    %58 = tpu.matmul %56, %57, %cst_27 {dimension_numbers = #tpu.dot_dimension_numbers<[1], [0], [0], [1], [0, 0, 1, 1], [], []>} : vector<16x128xbf16>, vector<128x128xbf16>, vector<16x128xf32> -> vector<16x128xf32>
    %59 = vector.broadcast %53 : vector<1x128xf32> to vector<16x128xf32>
    %60 = arith.addf %58, %59 : vector<16x128xf32>
    %61 = vector.shape_cast %60 : vector<16x128xf32> to vector<2x8x128xf32>
    %cst_28 = arith.constant dense<0.000000e+00> : vector<2x128xf32>
    %62 = vector.multi_reduction <add>, %61, %cst_28 [1] : vector<2x8x128xf32> to vector<2x128xf32>
    %63 = vector.shape_cast %62 : vector<2x128xf32> to vector<2x1x128xf32>
    %cst_29 = arith.constant 1.250000e-01 : f32
    %64 = vector.broadcast %cst_29 : f32 to vector<2x1x128xf32>
    %65 = arith.mulf %63, %64 : vector<2x1x128xf32>
    %66 = arith.mulf %61, %61 : vector<2x8x128xf32>
    %cst_30 = arith.constant dense<0.000000e+00> : vector<2x128xf32>
    %67 = vector.multi_reduction <add>, %66, %cst_30 [1] : vector<2x8x128xf32> to vector<2x128xf32>
    %68 = vector.shape_cast %67 : vector<2x128xf32> to vector<2x1x128xf32>
    %cst_31 = arith.constant 1.250000e-01 : f32
    %69 = vector.broadcast %cst_31 : f32 to vector<2x1x128xf32>
    %70 = arith.mulf %68, %69 : vector<2x1x128xf32>
    %71 = arith.mulf %65, %65 : vector<2x1x128xf32>
    %72 = arith.subf %70, %71 : vector<2x1x128xf32>
    %73 = vector.broadcast %65 : vector<2x1x128xf32> to vector<2x8x128xf32>
    %74 = arith.subf %61, %73 : vector<2x8x128xf32>
    %cst_32 = arith.constant 9.99999974E-6 : f32
    %75 = vector.broadcast %cst_32 : f32 to vector<2x1x128xf32>
    %76 = arith.addf %72, %75 : vector<2x1x128xf32>
    %77 = math.rsqrt %76 : vector<2x1x128xf32>
    %78 = vector.broadcast %77 : vector<2x1x128xf32> to vector<2x8x128xf32>
    %79 = arith.mulf %74, %78 : vector<2x8x128xf32>
    %80 = vector.shape_cast %79 : vector<2x8x128xf32> to vector<16x128xf32>
    %81 = vector.broadcast %54 : vector<1x128xf32> to vector<16x128xf32>
    %82 = arith.mulf %80, %81 : vector<16x128xf32>
    %83 = vector.broadcast %55 : vector<1x128xf32> to vector<16x128xf32>
    %84 = arith.addf %82, %83 : vector<16x128xf32>
    %cst_33 = arith.constant 0.000000e+00 : f32
    %85 = vector.broadcast %cst_33 : f32 to vector<16x128xf32>
    %86 = arith.maximumf %84, %85 : vector<16x128xf32>
    %87 = arith.truncf %86 : vector<16x128xf32> to vector<16x128xbf16>
    %c0_34 = arith.constant 0 : index
    %c0_35 = arith.constant 0 : index
    %88 = vector.load %arg14[%c0_34, %c0_35] : memref<128x128xbf16, #tpu.memory_space<vmem>>, vector<128x128xbf16>
    %cst_36 = arith.constant dense<0.000000e+00> : vector<16x128xf32>
    %89 = tpu.matmul %87, %88, %cst_36 {dimension_numbers = #tpu.dot_dimension_numbers<[1], [0], [0], [1], [0, 0, 1, 1], [], []>} : vector<16x128xbf16>, vector<128x128xbf16>, vector<16x128xf32> -> vector<16x128xf32>
    %c0_37 = arith.constant 0 : index
    %c0_38 = arith.constant 0 : index
    %90 = vector.load %arg15[%c0_37, %c0_38] : memref<1x128xf32, #tpu.memory_space<vmem>>, vector<1x128xf32>
    %91 = vector.broadcast %90 : vector<1x128xf32> to vector<16x128xf32>
    %92 = arith.addf %89, %91 : vector<16x128xf32>
    %c0_39 = arith.constant 0 : index
    %c0_40 = arith.constant 0 : index
    %93 = vector.load %arg9[%c0_39, %c0_40] : memref<3x256xf32, #tpu.memory_space<vmem>>, vector<3x256xf32>
    %94 = vector.extract_strided_slice %93 {offsets = [0, 0], sizes = [1, 256], strides = [1, 1]} : vector<3x256xf32> to vector<1x256xf32>
    %95 = vector.extract_strided_slice %93 {offsets = [1, 0], sizes = [1, 256], strides = [1, 1]} : vector<3x256xf32> to vector<1x256xf32>
    %96 = vector.extract_strided_slice %93 {offsets = [2, 0], sizes = [1, 256], strides = [1, 1]} : vector<3x256xf32> to vector<1x256xf32>
    %97 = arith.truncf %10 : vector<16x128xf32> to vector<16x128xbf16>
    %c0_41 = arith.constant 0 : index
    %c0_42 = arith.constant 0 : index
    %98 = vector.load %arg8[%c0_41, %c0_42] : memref<128x256xbf16, #tpu.memory_space<vmem>>, vector<128x256xbf16>
    %cst_43 = arith.constant dense<0.000000e+00> : vector<16x256xf32>
    %99 = tpu.matmul %97, %98, %cst_43 {dimension_numbers = #tpu.dot_dimension_numbers<[1], [0], [0], [1], [0, 0, 1, 1], [], []>} : vector<16x128xbf16>, vector<128x256xbf16>, vector<16x256xf32> -> vector<16x256xf32>
    %100 = vector.broadcast %94 : vector<1x256xf32> to vector<16x256xf32>
    %101 = arith.addf %99, %100 : vector<16x256xf32>
    %102 = vector.shape_cast %101 : vector<16x256xf32> to vector<2x8x256xf32>
    %cst_44 = arith.constant dense<0.000000e+00> : vector<2x256xf32>
    %103 = vector.multi_reduction <add>, %102, %cst_44 [1] : vector<2x8x256xf32> to vector<2x256xf32>
    %104 = vector.shape_cast %103 : vector<2x256xf32> to vector<2x1x256xf32>
    %cst_45 = arith.constant 1.250000e-01 : f32
    %105 = vector.broadcast %cst_45 : f32 to vector<2x1x256xf32>
    %106 = arith.mulf %104, %105 : vector<2x1x256xf32>
    %107 = arith.mulf %102, %102 : vector<2x8x256xf32>
    %cst_46 = arith.constant dense<0.000000e+00> : vector<2x256xf32>
    %108 = vector.multi_reduction <add>, %107, %cst_46 [1] : vector<2x8x256xf32> to vector<2x256xf32>
    %109 = vector.shape_cast %108 : vector<2x256xf32> to vector<2x1x256xf32>
    %cst_47 = arith.constant 1.250000e-01 : f32
    %110 = vector.broadcast %cst_47 : f32 to vector<2x1x256xf32>
    %111 = arith.mulf %109, %110 : vector<2x1x256xf32>
    %112 = arith.mulf %106, %106 : vector<2x1x256xf32>
    %113 = arith.subf %111, %112 : vector<2x1x256xf32>
    %114 = vector.broadcast %106 : vector<2x1x256xf32> to vector<2x8x256xf32>
    %115 = arith.subf %102, %114 : vector<2x8x256xf32>
    %cst_48 = arith.constant 9.99999974E-6 : f32
    %116 = vector.broadcast %cst_48 : f32 to vector<2x1x256xf32>
    %117 = arith.addf %113, %116 : vector<2x1x256xf32>
    %118 = math.rsqrt %117 : vector<2x1x256xf32>
    %119 = vector.broadcast %118 : vector<2x1x256xf32> to vector<2x8x256xf32>
    %120 = arith.mulf %115, %119 : vector<2x8x256xf32>
    %121 = vector.shape_cast %120 : vector<2x8x256xf32> to vector<16x256xf32>
    %122 = vector.broadcast %95 : vector<1x256xf32> to vector<16x256xf32>
    %123 = arith.mulf %121, %122 : vector<16x256xf32>
    %124 = vector.broadcast %96 : vector<1x256xf32> to vector<16x256xf32>
    %125 = arith.addf %123, %124 : vector<16x256xf32>
    %cst_49 = arith.constant 0.000000e+00 : f32
    %126 = vector.broadcast %cst_49 : f32 to vector<16x256xf32>
    %127 = arith.maximumf %125, %126 : vector<16x256xf32>
    %128 = arith.truncf %127 : vector<16x256xf32> to vector<16x256xbf16>
    %c0_50 = arith.constant 0 : index
    %c0_51 = arith.constant 0 : index
    %129 = vector.load %arg10[%c0_50, %c0_51] : memref<256x128xbf16, #tpu.memory_space<vmem>>, vector<256x128xbf16>
    %cst_52 = arith.constant dense<0.000000e+00> : vector<16x128xf32>
    %130 = tpu.matmul %128, %129, %cst_52 {dimension_numbers = #tpu.dot_dimension_numbers<[1], [0], [0], [1], [0, 0, 1, 1], [], []>} : vector<16x256xbf16>, vector<256x128xbf16>, vector<16x128xf32> -> vector<16x128xf32>
    %c0_53 = arith.constant 0 : index
    %c0_54 = arith.constant 0 : index
    %131 = vector.load %arg11[%c0_53, %c0_54] : memref<1x128xf32, #tpu.memory_space<vmem>>, vector<1x128xf32>
    %132 = vector.broadcast %131 : vector<1x128xf32> to vector<16x128xf32>
    %133 = arith.addf %130, %132 : vector<16x128xf32>
    %134 = arith.mulf %92, %133 : vector<16x128xf32>
    %cst_55 = arith.constant dense<0.000000e+00> : vector<16xf32>
    %135 = vector.multi_reduction <add>, %134, %cst_55 [1] : vector<16x128xf32> to vector<16xf32>
    %136 = vector.shape_cast %135 : vector<16xf32> to vector<16x1xf32>
    %137 = arith.mulf %92, %92 : vector<16x128xf32>
    %cst_56 = arith.constant dense<0.000000e+00> : vector<16xf32>
    %138 = vector.multi_reduction <add>, %137, %cst_56 [1] : vector<16x128xf32> to vector<16xf32>
    %139 = vector.shape_cast %138 : vector<16xf32> to vector<16x1xf32>
    %cst_57 = arith.constant 1.000000e-16 : f32
    %140 = vector.broadcast %cst_57 : f32 to vector<16x1xf32>
    %141 = arith.maximumf %139, %140 : vector<16x1xf32>
    %142 = arith.mulf %133, %133 : vector<16x128xf32>
    %cst_58 = arith.constant dense<0.000000e+00> : vector<16xf32>
    %143 = vector.multi_reduction <add>, %142, %cst_58 [1] : vector<16x128xf32> to vector<16xf32>
    %144 = vector.shape_cast %143 : vector<16xf32> to vector<16x1xf32>
    %cst_59 = arith.constant 1.000000e-16 : f32
    %145 = vector.broadcast %cst_59 : f32 to vector<16x1xf32>
    %146 = arith.maximumf %144, %145 : vector<16x1xf32>
    %147 = arith.mulf %141, %146 : vector<16x1xf32>
    %148 = math.rsqrt %147 : vector<16x1xf32>
    %149 = arith.mulf %136, %148 : vector<16x1xf32>
    %cst_60 = arith.constant dense<0.000000e+00> : vector<1xf32>
    %150 = vector.multi_reduction <add>, %149, %cst_60 [0] : vector<16x1xf32> to vector<1xf32>
    %151 = vector.shape_cast %150 : vector<1xf32> to vector<1x1xf32>
    %cst_61 = arith.constant 0.000000e+00 : f32
    %152 = vector.broadcast %cst_61 : f32 to vector<1x1xf32>
    %153 = arith.subf %152, %151 : vector<1x1xf32>
    %cst_62 = arith.constant 6.250000e-02 : f32
    %154 = vector.broadcast %cst_62 : f32 to vector<1x1xf32>
    %155 = arith.mulf %153, %154 : vector<1x1xf32>
    %c0_63 = arith.constant 0 : index
    %c0_64 = arith.constant 0 : index
    %156 = vector.load %arg16[%c0_63, %c0_64] : memref<1x1xf32, #tpu.memory_space<vmem>>, vector<1x1xf32>
    tpu.vector_store %arg16[%c0_63, %c0_64], %155 {strides = array<i32>} : memref<1x1xf32, #tpu.memory_space<vmem>>, vector<1x1xf32>,
    return
  }
}

</mosaic_0001>

<bundles_post_ra>
// kernel: byol_forward.1
= control target key start
LH: loop header
LB: loop body
LE: loop exit
PB: predicated region body
PF: predicated region fallthrough
CT: control target
= control target key end

     0   :  { %s4219_s0 = inlined_call_operand.vmem [shape: f32[8,768], index: 0, kind: input, shape index: {}]   ;;  %s4220_s1 = inlined_call_operand.vmem [shape: f32[8,768], index: 1, kind: input, shape index: {}]   ;;  %s4221_s2 = inlined_call_operand.vmem [shape: bf16[768,256], index: 2, kind: input, shape index: {}]   ;;  %s4222_s3 = inlined_call_operand.vmem [shape: f32[1,256], index: 3, kind: input, shape index: {}]   ;;  %s4223_s4 = inlined_call_operand.vmem [shape: bf16[128,256], index: 4, kind: input, shape index: {}]   ;;  %s4224_s5 = inlined_call_operand.vmem [shape: f32[3,256], index: 5, kind: input, shape index: {}]   ;;  %s4225_s6 = inlined_call_operand.vmem [shape: bf16[256,128], index: 6, kind: input, shape index: {}]   ;;  %s4226_s7 = inlined_call_operand.vmem [shape: f32[1,128], index: 7, kind: input, shape index: {}]   ;;  %s4227_s8 = inlined_call_operand.vmem [shape: bf16[128,256], index: 8, kind: input, shape index: {}]   ;;  %s4228_s9 = inlined_call_operand.vmem [shape: f32[3,256], index: 9, kind: input, shape index: {}]   ;;  %s4229_s10 = inlined_call_operand.vmem [shape: bf16[256,128], index: 10, kind: input, shape index: {}]   ;;  %s4230_s11 = inlined_call_operand.vmem [shape: f32[1,128], index: 11, kind: input, shape index: {}]   ;;  %s4231_s12 = inlined_call_operand.vmem [shape: bf16[128,128], index: 12, kind: input, shape index: {}]   ;;  %s4232_s13 = inlined_call_operand.vmem [shape: f32[3,128], index: 13, kind: input, shape index: {}]   ;;  %s4233_s14 = inlined_call_operand.vmem [shape: bf16[128,128], index: 14, kind: input, shape index: {}]   ;;  %s4234_s15 = inlined_call_operand.vmem [shape: f32[1,128], index: 15, kind: input, shape index: {}]   ;;  %s4235_s16 = inlined_call_operand.hbm [shape: f32[1,1], index: 16, kind: output, shape index: {}]  }
   0x1   :  { %4237 = sst [smem:[#allocation5_spill]] %s4219_s0 }
   0x2   :  { %v2063_v0 = vld [vmem:[%s4221_s2 + $0x70] sm:$0xf]  ;;  %v2724_v1 = vld [vmem:[%s4221_s2 + $0x74] sm:$0xf0]  ;;  %v2055_v9 = vld [vmem:[%s4221_s2 + $0x60] sm:$0xf] }
   0x3   :  { %v2127_v2 = vld [vmem:[%s4221_s2 + $0xf0] sm:$0xf]  ;;  %v2064_v3 = vor.u32 %v2724_v1, %v2063_v0  ;;  %v2740_v4 = vld [vmem:[%s4221_s2 + $0xf4] sm:$0xf0]  ;;  %v2722_v10 = vld [vmem:[%s4221_s2 + $0x64] sm:$0xf0] }
   0x4   :  { %v2191_v5 = vld [vmem:[%s4221_s2 + $0x170] sm:$0xf]  ;;  %v2756_v6 = vld [vmem:[%s4221_s2 + $0x174] sm:$0xf0]  ;;  %v2128_v7 = vor.u32 %v2740_v4, %v2127_v2  ;;  %v2119_v11 = vld [vmem:[%s4221_s2 + $0xe0] sm:$0xf]  ;;  %v2056_v12 = vor.u32 %v2722_v10, %v2055_v9 }
   0x5   :  { %v2192_v8 = vor.u32 %v2756_v6, %v2191_v5  ;;  %654 = vmatpush.bf16.msra.mxu0 %v2064_v3  ;;  %v2738_v13 = vld [vmem:[%s4221_s2 + $0xe4] sm:$0xf0]  ;;  %v2255_v14 = vld [vmem:[%s4221_s2 + $0x1f0] sm:$0xf]  ;;  %v2772_v15 = vld [vmem:[%s4221_s2 + $0x1f4] sm:$0xf0] }
   0x6   :  { %668 = vmatpush.bf16.msra.mxu1 %v2128_v7  ;;  %v2120_v16 = vor.u32 %v2738_v13, %v2119_v11  ;;  %v2256_v17 = vor.u32 %v2772_v15, %v2255_v14  ;;  %v2183_v18 = vld [vmem:[%s4221_s2 + $0x160] sm:$0xf]  ;;  %v2754_v19 = vld [vmem:[%s4221_s2 + $0x164] sm:$0xf0]  ;;  %v2047_v20 = vld [vmem:[%s4221_s2 + $0x50] sm:$0xf] }
   0x7   :  { %682 = vmatpush.bf16.msra.mxu2 %v2192_v8  ;;  %v2184_v21 = vor.u32 %v2754_v19, %v2183_v18  ;;  %v2720_v22 = vld [vmem:[%s4221_s2 + $0x54] sm:$0xf0]  ;;  %v2111_v23 = vld [vmem:[%s4221_s2 + $0xd0] sm:$0xf]  ;;  %v2247_v25 = vld [vmem:[%s4221_s2 + $0x1e0] sm:$0xf] }
   0x8   :  { %v2736_v24 = vld [vmem:[%s4221_s2 + $0xd4] sm:$0xf0]  ;;  %696 = vmatpush.bf16.msra.mxu3 %v2256_v17  ;;  %v2770_v26 = vld [vmem:[%s4221_s2 + $0x1e4] sm:$0xf0]  ;;  %v2175_v27 = vld [vmem:[%s4221_s2 + $0x150] sm:$0xf]  ;;  %v2048_v28 = vor.u32 %v2720_v22, %v2047_v20 }
   0x9   :  { %655 = vmatpush.bf16.msra.mxu0 %v2056_v12  ;;  %v2248_v29 = vor.u32 %v2770_v26, %v2247_v25  ;;  %v2752_v30 = vld [vmem:[%s4221_s2 + $0x154] sm:$0xf0]  ;;  %v2039_v31 = vld [vmem:[%s4221_s2 + $0x40] sm:$0xf]  ;;  %v2718_v32 = vld [vmem:[%s4221_s2 + $0x44] sm:$0xf0]  ;;  %v2112_v33 = vor.u32 %v2736_v24, %v2111_v23 }
   0xa   :  { %669 = vmatpush.bf16.msra.mxu1 %v2120_v16  ;;  %v2176_v34 = vor.u32 %v2752_v30, %v2175_v27  ;;  %v2103_v35 = vld [vmem:[%s4221_s2 + $0xc0] sm:$0xf]  ;;  %v2734_v36 = vld [vmem:[%s4221_s2 + $0xc4] sm:$0xf0]  ;;  %v2239_v37 = vld [vmem:[%s4221_s2 + $0x1d0] sm:$0xf]  ;;  %v2040_v42 = vor.u32 %v2718_v32, %v2039_v31 }
   0xb   :  { %683 = vmatpush.bf16.msra.mxu2 %v2184_v21  ;;  %v2768_v38 = vld [vmem:[%s4221_s2 + $0x1d4] sm:$0xf0]  ;;  %v2167_v39 = vld [vmem:[%s4221_s2 + $0x140] sm:$0xf]  ;;  %v2750_v40 = vld [vmem:[%s4221_s2 + $0x144] sm:$0xf0]  ;;  %v2104_v45 = vor.u32 %v2734_v36, %v2103_v35 }
   0xc   :  { %697 = vmatpush.bf16.msra.mxu3 %v2248_v29  ;;  %v2240_v41 = vor.u32 %v2768_v38, %v2239_v37  ;;  %v2231_v43 = vld [vmem:[%s4221_s2 + $0x1c0] sm:$0xf]  ;;  %v2766_v44 = vld [vmem:[%s4221_s2 + $0x1c4] sm:$0xf0]  ;;  %v2168_v46 = vor.u32 %v2750_v40, %v2167_v39  ;;  %v2031_v47 = vld [vmem:[%s4221_s2 + $0x30] sm:$0xf] }
   0xd   :  { %656 = vmatpush.bf16.msra.mxu0 %v2048_v28  ;;  %v2716_v48 = vld [vmem:[%s4221_s2 + $0x34] sm:$0xf0]  ;;  %v2095_v49 = vld [vmem:[%s4221_s2 + $0xb0] sm:$0xf]  ;;  %v2232_v53 = vor.u32 %v2766_v44, %v2231_v43  ;;  %v2023_v59 = vld [vmem:[%s4221_s2 + $0x20] sm:$0xf] }
   0xe   :  { %670 = vmatpush.bf16.msra.mxu1 %v2112_v33  ;;  %v2732_v50 = vld [vmem:[%s4221_s2 + $0xb4] sm:$0xf0]  ;;  %v2159_v51 = vld [vmem:[%s4221_s2 + $0x130] sm:$0xf]  ;;  %v2032_v54 = vor.u32 %v2716_v48, %v2031_v47  ;;  %v2714_v60 = vld [vmem:[%s4221_s2 + $0x24] sm:$0xf0] }
   0xf   :  { %684 = vmatpush.bf16.msra.mxu2 %v2176_v34  ;;  %v2748_v52 = vld [vmem:[%s4221_s2 + $0x134] sm:$0xf0]  ;;  %v2223_v55 = vld [vmem:[%s4221_s2 + $0x1b0] sm:$0xf]  ;;  %v2096_v57 = vor.u32 %v2732_v50, %v2095_v49  ;;  %v2087_v61 = vld [vmem:[%s4221_s2 + $0xa0] sm:$0xf]  ;;  %v2024_v2 = vor.u32 %v2714_v60, %v2023_v59 }
  0x10   :  { %698 = vmatpush.bf16.msra.mxu3 %v2240_v41  ;;  %v2764_v56 = vld [vmem:[%s4221_s2 + $0x1b4] sm:$0xf0]  ;;  %v2160_v58 = vor.u32 %v2748_v52, %v2159_v51  ;;  %v2730_v62 = vld [vmem:[%s4221_s2 + $0xa4] sm:$0xf0]  ;;  %v2151_v63 = vld [vmem:[%s4221_s2 + $0x120] sm:$0xf] }
  0x11   :  { %657 = vmatpush.bf16.msra.mxu0 %v2040_v42  ;;  %v2746_v0 = vld [vmem:[%s4221_s2 + $0x124] sm:$0xf0]  ;;  %v2224_v1 = vor.u32 %v2764_v56, %v2223_v55  ;;  %v2215_v3 = vld [vmem:[%s4221_s2 + $0x1a0] sm:$0xf]  ;;  %v2088_v5 = vor.u32 %v2730_v62, %v2087_v61  ;;  %v2015_v7 = vld [vmem:[%s4221_s2 + $0x10] sm:$0xf] }
  0x12   :  { %671 = vmatpush.bf16.msra.mxu1 %v2104_v45  ;;  %v2762_v4 = vld [vmem:[%s4221_s2 + $0x1a4] sm:$0xf0]  ;;  %v2152_v6 = vor.u32 %v2746_v0, %v2151_v63  ;;  %v2712_v8 = vld [vmem:[%s4221_s2 + $0x14] sm:$0xf0]  ;;  %v2079_v9 = vld [vmem:[%s4221_s2 + $0x90] sm:$0xf] }
  0x13   :  { %685 = vmatpush.bf16.msra.mxu2 %v2168_v46  ;;  %v2728_v10 = vld [vmem:[%s4221_s2 + $0x94] sm:$0xf0]  ;;  %v2143_v11 = vld [vmem:[%s4221_s2 + $0x110] sm:$0xf]  ;;  %v2216_v13 = vor.u32 %v2762_v4, %v2215_v3  ;;  %v2007_v14 = vld [vmem:[%s4221_s2] sm:$0xf]  ;;  %v2016_v16 = vor.u32 %v2712_v8, %v2015_v7 }
  0x14   :  { %699 = vmatpush.bf16.msra.mxu3 %v2232_v53  ;;  %v2744_v12 = vld [vmem:[%s4221_s2 + $0x114] sm:$0xf0]  ;;  %v2710_v15 = vld [vmem:[%s4221_s2 + $0x4] sm:$0xf0]  ;;  %v2071_v17 = vld [vmem:[%s4221_s2 + $0x80] sm:$0xf]  ;;  %v2080_v20 = vor.u32 %v2728_v10, %v2079_v9 }
  0x15   :  { %658 = vmatpush.bf16.msra.mxu0 %v2032_v54  ;;  %v2207_v18 = vld [vmem:[%s4221_s2 + $0x190] sm:$0xf]  ;;  %v2760_v19 = vld [vmem:[%s4221_s2 + $0x194] sm:$0xf0]  ;;  %v2144_v21 = vor.u32 %v2744_v12, %v2143_v11  ;;  %v2726_v22 = vld [vmem:[%s4221_s2 + $0x84] sm:$0xf0]  ;;  %v2008_v32 = vor.u32 %v2710_v15, %v2007_v14 }
  0x16   :  { %672 = vmatpush.bf16.msra.mxu1 %v2096_v57  ;;  %v2319_v23 = vld [vmem:[%s4221_s2 + $0x270] sm:$0xf]  ;;  %v2788_v24 = vld [vmem:[%s4221_s2 + $0x274] sm:$0xf0]  ;;  %v2135_v27 = vld [vmem:[%s4221_s2 + $0x100] sm:$0xf]  ;;  %v2208_v28 = vor.u32 %v2760_v19, %v2207_v18  ;;  %v2072_v36 = vor.u32 %v2726_v22, %v2071_v17 }
  0x17   :  { %686 = vmatpush.bf16.msra.mxu2 %v2160_v58  ;;  %v2383_v25 = vld [vmem:[%s4221_s2 + $0x2f0] sm:$0xf]  ;;  %v2804_v26 = vld [vmem:[%s4221_s2 + $0x2f4] sm:$0xf0]  ;;  %v2742_v29 = vld [vmem:[%s4221_s2 + $0x104] sm:$0xf0]  ;;  %v2320_v37 = vor.u32 %v2788_v24, %v2319_v23 }
  0x18   :  { %700 = vmatpush.bf16.msra.mxu3 %v2224_v1  ;;  %v2199_v30 = vld [vmem:[%s4221_s2 + $0x180] sm:$0xf]  ;;  %v2758_v31 = vld [vmem:[%s4221_s2 + $0x184] sm:$0xf0]  ;;  %s4238_s26 = sld [smem:[#allocation5_spill]]  ;;  %v2384_v41 = vor.u32 %v2804_v26, %v2383_v25  ;;  %v2136_v42 = vor.u32 %v2742_v29, %v2135_v27  ;;  %v62_v45 = vld [vmem:[%s4220_s1 + $0x10] sm:$0xff] }
  0x19   :  { %659 = vmatpush.bf16.msra.mxu0 %v2024_v2  ;;  %v2311_v33 = vld [vmem:[%s4221_s2 + $0x260] sm:$0xf]  ;;  %v2786_v38 = vld [vmem:[%s4221_s2 + $0x264] sm:$0xf0]  ;;  %v2200_v46 = vor.u32 %v2758_v31, %v2199_v30  ;;  %v63_v50 = vld [vmem:[%s4220_s1 + $0x18] sm:$0xff] }
  0x1a   :  { %673 = vmatpush.bf16.msra.mxu1 %v2088_v5  ;;  %v60_v35 = vld [vmem:[%s4220_s1] sm:$0xff]  ;;  %v61_v40 = vld [vmem:[%s4220_s1 + $0x8] sm:$0xff]  ;;  %v2312_v52 = vor.u32 %v2786_v38, %v2311_v33  ;;  %v2303_v56 = vld [vmem:[%s4221_s2 + $0x250] sm:$0xf] }
  0x1b   :  { %687 = vmatpush.bf16.msra.mxu2 %v2152_v6  ;;  %v2375_v43 = vld [vmem:[%s4221_s2 + $0x2e0] sm:$0xf]  ;;  %v2802_v47 = vld [vmem:[%s4221_s2 + $0x2e4] sm:$0xf0]  ;;  %v2784_v57 = vld [vmem:[%s4221_s2 + $0x254] sm:$0xf0] }
  0x1c   :  { %701 = vmatpush.bf16.msra.mxu3 %v2216_v13  ;;  %v2376_v54 = vor.u32 %v2802_v47, %v2375_v43  ;;  %v2367_v58 = vld [vmem:[%s4221_s2 + $0x2d0] sm:$0xf]  ;;  %v2800_v59 = vld [vmem:[%s4221_s2 + $0x2d4] sm:$0xf0]  ;;  %v2295_v60 = vld [vmem:[%s4221_s2 + $0x240] sm:$0xf]  ;;  %v2304_v62 = vor.u32 %v2784_v57, %v2303_v56 }
  0x1d   :  { %660 = vmatpush.bf16.msra.mxu0 %v2016_v16  ;;  %v2782_v61 = vld [vmem:[%s4221_s2 + $0x244] sm:$0xf0]  ;;  %v2359_v63 = vld [vmem:[%s4221_s2 + $0x2c0] sm:$0xf]  ;;  %v2723_v0 = vld [vmem:[%s4221_s2 + $0x74] sm:$0xf]  ;;  %v2368_v3 = vor.u32 %v2800_v59, %v2367_v58 }
  0x1e   :  { %v54_v34 = vld [vmem:[%s4238_s26] sm:$0xff]  ;;  %674 = vmatpush.bf16.msra.mxu1 %v2080_v20  ;;  %v55_v39 = vld [vmem:[%s4238_s26 + $0x8] sm:$0xff]  ;;  %v56_v44 = vld [vmem:[%s4238_s26 + $0x10] sm:$0xff]  ;;  %v2296_v13 = vor.u32 %v2782_v61, %v2295_v60 }
  0x1f   :  { %688 = vmatpush.bf16.msra.mxu2 %v2144_v21  ;;  %v3259_v48 = vpack.c.bf16 %v60_v35, %v54_v34  ;;  %v57_v49 = vld [vmem:[%s4238_s26 + $0x18] sm:$0xff]  ;;  %v3267_v51 = vpack.c.bf16 %v61_v40, %v55_v39  ;;  %v3269_v53 = vpack.c.bf16 %v62_v45, %v56_v44  ;;  %v2739_v2 = vld [vmem:[%s4221_s2 + $0xf4] sm:$0xf]  ;;  %v2721_v6 = vld [vmem:[%s4221_s2 + $0x64] sm:$0xf] }
  0x20   :  { %702 = vmatpush.bf16.msra.mxu3 %v2208_v28  ;;  %v3271_v55 = vpack.c.bf16 %v63_v50, %v57_v49  ;;  %v2065_v1 = vld [vmem:[%s4221_s2 + $0x78] sm:$0xf0]  ;;  %v2057_v7 = vld [vmem:[%s4221_s2 + $0x68] sm:$0xf0]  ;;  %v2798_v8 = vld [vmem:[%s4221_s2 + $0x2c4] sm:$0xf0] }
  0x21   :  { %661 = vmatpush.bf16.msra.mxu0 %v2008_v32  ;;  %v2068_v4 = vor.u32 %v2723_v0, %v2065_v1  ;;  %v2129_v5 = vld [vmem:[%s4221_s2 + $0xf8] sm:$0xf0]  ;;  %v2737_v10 = vld [vmem:[%s4221_s2 + $0xe4] sm:$0xf]  ;;  %v2121_v11 = vld [vmem:[%s4221_s2 + $0xe8] sm:$0xf0]  ;;  %v2060_v12 = vor.u32 %v2721_v6, %v2057_v7  ;;  %v2360_v18 = vor.u32 %v2798_v8, %v2359_v63 }
  0x22   :  { %675 = vmatpush.bf16.msra.mxu1 %v2072_v36  ;;  %v2132_v9 = vor.u32 %v2739_v2, %v2129_v5  ;;  %v2287_v14 = vld [vmem:[%s4221_s2 + $0x230] sm:$0xf]  ;;  %v2124_v15 = vor.u32 %v2737_v10, %v2121_v11  ;;  %v2719_v16 = vld [vmem:[%s4221_s2 + $0x54] sm:$0xf]  ;;  %v2049_v17 = vld [vmem:[%s4221_s2 + $0x58] sm:$0xf0] }
  0x23   :  { %689 = vmatpush.bf16.msra.mxu2 %v2136_v42  ;;  %v2780_v19 = vld [vmem:[%s4221_s2 + $0x234] sm:$0xf0]  ;;  %v2735_v20 = vld [vmem:[%s4221_s2 + $0xd4] sm:$0xf]  ;;  %v2113_v21 = vld [vmem:[%s4221_s2 + $0xd8] sm:$0xf0]  ;;  %v2052_v24 = vor.u32 %v2719_v16, %v2049_v17 }
  0x24   :  { %703 = vmatpush.bf16.msra.mxu3 %v2200_v46  ;;  %662 = vmatmul.bf16.vlgmr.msra.gmra.mxu0 %v3259_v48  ;;  %v2351_v22 = vld [vmem:[%s4221_s2 + $0x2b0] sm:$0xf]  ;;  %v2796_v23 = vld [vmem:[%s4221_s2 + $0x2b4] sm:$0xf0]  ;;  %v2288_v25 = vor.u32 %v2780_v19, %v2287_v14  ;;  %v2279_v26 = vld [vmem:[%s4221_s2 + $0x220] sm:$0xf]  ;;  %v2116_v27 = vor.u32 %v2735_v20, %v2113_v21 }
  0x25   :  { %710 = vmatpush.bf16.msrb.mxu0 %v2320_v37  ;;  %676 = vmatmul.bf16.vlgmr.msra.gmra.mxu1 %v3267_v51  ;;  %v2717_v28 = vld [vmem:[%s4221_s2 + $0x44] sm:$0xf]  ;;  %v2041_v29 = vld [vmem:[%s4221_s2 + $0x48] sm:$0xf0]  ;;  %v2352_v30 = vor.u32 %v2796_v23, %v2351_v22  ;;  %v2778_v31 = vld [vmem:[%s4221_s2 + $0x224] sm:$0xf0] }
  0x26   :  { %724 = vmatpush.bf16.msrb.mxu1 %v2384_v41  ;;  %690 = vmatmul.bf16.vlgmr.msra.gmra.mxu2 %v3269_v53  ;;  %v2733_v32 = vld [vmem:[%s4221_s2 + $0xc4] sm:$0xf]  ;;  %v2105_v33 = vld [vmem:[%s4221_s2 + $0xc8] sm:$0xf0]  ;;  %v2343_v34 = vld [vmem:[%s4221_s2 + $0x2a0] sm:$0xf]  ;;  %v2044_v36 = vor.u32 %v2717_v28, %v2041_v29  ;;  %v2280_v37 = vor.u32 %v2778_v31, %v2279_v26 }
  0x27   :  { %704 = vmatmul.bf16.vlgmr.msra.gmra.mxu3 %v3271_v55  ;;  %738 = vmatpush.bf16.msrb.mxu2 %v2068_v4  ;;  %v2794_v35 = vld [vmem:[%s4221_s2 + $0x2a4] sm:$0xf0]  ;;  %v2271_v38 = vld [vmem:[%s4221_s2 + $0x210] sm:$0xf]  ;;  %v2108_v39 = vor.u32 %v2733_v32, %v2105_v33  ;;  %v2715_v40 = vld [vmem:[%s4221_s2 + $0x34] sm:$0xf] }
  0x28   :  { %752 = vmatpush.bf16.msrb.mxu3 %v2132_v9  ;;  %v2033_v41 = vld [vmem:[%s4221_s2 + $0x38] sm:$0xf0]  ;;  %v2344_v42 = vor.u32 %v2794_v35, %v2343_v34  ;;  %v2776_v43 = vld [vmem:[%s4221_s2 + $0x214] sm:$0xf0]  ;;  %v2731_v44 = vld [vmem:[%s4221_s2 + $0xb4] sm:$0xf] }
  0x29   :  { %711 = vmatpush.bf16.msrb.mxu0 %v2312_v52  ;;  %v2097_v45 = vld [vmem:[%s4221_s2 + $0xb8] sm:$0xf0]  ;;  %v2335_v46 = vld [vmem:[%s4221_s2 + $0x290] sm:$0xf]  ;;  %v2792_v47 = vld [vmem:[%s4221_s2 + $0x294] sm:$0xf0]  ;;  %v2036_v52 = vor.u32 %v2715_v40, %v2033_v41 }
  0x2a   :  { %725 = vmatpush.bf16.msrb.mxu1 %v2376_v54  ;;  %v2263_v49 = vld [vmem:[%s4221_s2 + $0x200] sm:$0xf]  ;;  %v2774_v50 = vld [vmem:[%s4221_s2 + $0x204] sm:$0xf0]  ;;  %v2272_v54 = vor.u32 %v2776_v43, %v2271_v38  ;;  %v2100_v57 = vor.u32 %v2731_v44, %v2097_v45  ;;  %v2713_v58 = vld [vmem:[%s4221_s2 + $0x24] sm:$0xf]  ;;  %v2336_v60 = vor.u32 %v2792_v47, %v2335_v46 }
  0x2b   :  { %739 = vmatpush.bf16.msrb.mxu2 %v2060_v12  ;;  %v2327_v56 = vld [vmem:[%s4221_s2 + $0x280] sm:$0xf]  ;;  %v2025_v59 = vld [vmem:[%s4221_s2 + $0x28] sm:$0xf0]  ;;  %v2790_v61 = vld [vmem:[%s4221_s2 + $0x284] sm:$0xf0]  ;;  %v2264_v7 = vor.u32 %v2774_v50, %v2263_v49 }
  0x2c   :  { %753 = vmatpush.bf16.msrb.mxu3 %v2124_v15  ;;  %v2089_v63 = vld [vmem:[%s4221_s2 + $0xa8] sm:$0xf0]  ;;  %v58_v0 = vld [vmem:[%s4238_s26 + $0x20] sm:$0xff]  ;;  %v2755_v1 = vld [vmem:[%s4221_s2 + $0x174] sm:$0xf]  ;;  %v2028_v4 = vor.u32 %v2713_v58, %v2025_v59  ;;  %v2328_v12 = vor.u32 %v2790_v61, %v2327_v56 }
  0x2d   :  { %712 = vmatpush.bf16.msrb.mxu0 %v2304_v62  ;;  %v2729_v62 = vld [vmem:[%s4221_s2 + $0xa4] sm:$0xf]  ;;  %v2193_v2 = vld [vmem:[%s4221_s2 + $0x178] sm:$0xf0]  ;;  %v2771_v5 = vld [vmem:[%s4221_s2 + $0x1f4] sm:$0xf] }
  0x2e   :  { %726 = vmatpush.bf16.msrb.mxu1 %v2368_v3  ;;  %v64_v3 = vld [vmem:[%s4220_s1 + $0x20] sm:$0xff]  ;;  %v2257_v6 = vld [vmem:[%s4221_s2 + $0x1f8] sm:$0xf0]  ;;  %v59_v8 = vld [vmem:[%s4238_s26 + $0x28] sm:$0xff]  ;;  %v2092_v9 = vor.u32 %v2729_v62, %v2089_v63  ;;  %v2196_v16 = vor.u32 %v2755_v1, %v2193_v2 }
  0x2f   :  { %740 = vmatpush.bf16.msrb.mxu2 %v2052_v24  ;;  %v2711_v10 = vld [vmem:[%s4221_s2 + $0x14] sm:$0xf]  ;;  %v2017_v11 = vld [vmem:[%s4221_s2 + $0x18] sm:$0xf0]  ;;  %v2260_v17 = vor.u32 %v2771_v5, %v2257_v6  ;;  %v2009_v19 = vld [vmem:[%s4221_s2 + $0x8] sm:$0xf0]  ;;  %v3469_v22 = vpack.c.bf16 %v64_v3, %v58_v0 }
  0x30   :  { %754 = vmatpush.bf16.msrb.mxu3 %v2116_v27  ;;  %v2727_v14 = vld [vmem:[%s4221_s2 + $0x94] sm:$0xf]  ;;  %v2081_v15 = vld [vmem:[%s4221_s2 + $0x98] sm:$0xf0]  ;;  %v2753_v20 = vld [vmem:[%s4221_s2 + $0x164] sm:$0xf]  ;;  %v2020_v23 = vor.u32 %v2711_v10, %v2017_v11 }
  0x31   :  { %713 = vmatpush.bf16.msrb.mxu0 %v2296_v13  ;;  %v65_v13 = vld [vmem:[%s4220_s1 + $0x28] sm:$0xff]  ;;  %v2787_v24 = vld [vmem:[%s4221_s2 + $0x274] sm:$0xf]  ;;  %v2725_v26 = vld [vmem:[%s4221_s2 + $0x84] sm:$0xf] }
  0x32   :  { %727 = vmatpush.bf16.msrb.mxu1 %v2360_v18  ;;  %v2709_v18 = vld [vmem:[%s4221_s2 + $0x4] sm:$0xf]  ;;  %v2185_v21 = vld [vmem:[%s4221_s2 + $0x168] sm:$0xf0]  ;;  %v3486_v29 = vpack.c.bf16 %v65_v13, %v59_v8  ;;  %v2803_v32 = vld [vmem:[%s4221_s2 + $0x2f4] sm:$0xf] }
  0x33   :  { %741 = vmatpush.bf16.msrb.mxu2 %v2044_v36  ;;  %v2769_v27 = vld [vmem:[%s4221_s2 + $0x1e4] sm:$0xf]  ;;  %v2249_v28 = vld [vmem:[%s4221_s2 + $0x1e8] sm:$0xf0]  ;;  %v2385_v33 = vld [vmem:[%s4221_s2 + $0x2f8] sm:$0xf0]  ;;  %v2188_v34 = vor.u32 %v2753_v20, %v2185_v21 }
  0x34   :  { %755 = vmatpush.bf16.msrb.mxu3 %v2108_v39  ;;  %v2073_v31 = vld [vmem:[%s4221_s2 + $0x88] sm:$0xf0]  ;;  %v2751_v35 = vld [vmem:[%s4221_s2 + $0x154] sm:$0xf]  ;;  %v2252_v36 = vor.u32 %v2769_v27, %v2249_v28 }
  0x35   :  { %714 = vmatpush.bf16.msrb.mxu0 %v2288_v25  ;;  %v2321_v25 = vld [vmem:[%s4221_s2 + $0x278] sm:$0xf0] }
  0x36   :  { %728 = vmatpush.bf16.msrb.mxu1 %v2352_v30  ;;  %v2084_v30 = vor.u32 %v2727_v14, %v2081_v15 }
  0x37   :  { %742 = vmatpush.bf16.msrb.mxu2 %v2036_v52 }
  0x38   :  { %756 = vmatpush.bf16.msrb.mxu3 %v2100_v57 }
  0x39   :  { %715 = vmatpush.bf16.msrb.mxu0 %v2280_v37  ;;  %v2177_v37 = vld [vmem:[%s4221_s2 + $0x158] sm:$0xf0] }
  0x3a   :  { %729 = vmatpush.bf16.msrb.mxu1 %v2344_v42 }
  0x3b   :  { %743 = vmatpush.bf16.msrb.mxu2 %v2028_v4 }
  0x3c   :  { %757 = vmatpush.bf16.msrb.mxu3 %v2092_v9 }
  0x3d   :  { %716 = vmatpush.bf16.msrb.mxu0 %v2272_v54 }
  0x3e   :  { %730 = vmatpush.bf16.msrb.mxu1 %v2336_v60 }
  0x41   :  { %717 = vmatpush.bf16.msrb.mxu0 %v2264_v7 }
  0x42   :  { %731 = vmatpush.bf16.msrb.mxu1 %v2328_v12 }
  0x45   :  { %766 = vmatpush.bf16.msra.mxu0 %v2196_v16 }
  0x46   :  { %780 = vmatpush.bf16.msra.mxu1 %v2260_v17 }
  0x47   :  { %21 = vsyncpa [#allocation3], 0  ;;  %718 = vmatmul.bf16.vlgmr.msrb.gmra.mxu0 %v3469_v22  ;;  %744 = vmatpush.bf16.msrb.mxu2 %v2020_v23  ;;  %v2012_v38 = vor.u32 %v2709_v18, %v2009_v19  ;;  %v2767_v39 = vld [vmem:[%s4221_s2 + $0x1d4] sm:$0xf]  ;;  %v2241_v40 = vld [vmem:[%s4221_s2 + $0x1d8] sm:$0xf0]  ;;  %v2324_v41 = vor.u32 %v2787_v24, %v2321_v25  ;;  %v2076_v42 = vor.u32 %v2725_v26, %v2073_v31 }
  0x48   :  { %732 = vmatmul.bf16.vlgmr.msrb.gmra.mxu1 %v3486_v29  ;;  %758 = vmatpush.bf16.msrb.mxu3 %v2084_v30  ;;  %v2388_v43 = vor.u32 %v2803_v32, %v2385_v33  ;;  %v2785_v44 = vld [vmem:[%s4221_s2 + $0x264] sm:$0xf]  ;;  %v2313_v45 = vld [vmem:[%s4221_s2 + $0x268] sm:$0xf0]  ;;  %v2180_v46 = vor.u32 %v2751_v35, %v2177_v37  ;;  %v2244_v49 = vor.u32 %v2767_v39, %v2241_v40  ;;  %v2783_v60 = vld [vmem:[%s4221_s2 + $0x254] sm:$0xf] }
  0x49   :  { %767 = vmatpush.bf16.msra.mxu0 %v2188_v34  ;;  %v2801_v47 = vld [vmem:[%s4221_s2 + $0x2e4] sm:$0xf]  ;;  %v2377_v50 = vld [vmem:[%s4221_s2 + $0x2e8] sm:$0xf0]  ;;  %v2316_v58 = vor.u32 %v2785_v44, %v2313_v45  ;;  %v2305_v61 = vld [vmem:[%s4221_s2 + $0x258] sm:$0xf0] }
  0x4a   :  { %781 = vmatpush.bf16.msra.mxu1 %v2252_v36  ;;  %v2749_v52 = vld [vmem:[%s4221_s2 + $0x144] sm:$0xf]  ;;  %v2169_v54 = vld [vmem:[%s4221_s2 + $0x148] sm:$0xf0]  ;;  %v2380_v59 = vor.u32 %v2801_v47, %v2377_v50  ;;  %v2799_v63 = vld [vmem:[%s4221_s2 + $0x2d4] sm:$0xf]  ;;  %v2308_v6 = vor.u32 %v2783_v60, %v2305_v61 }
  0x4b   :  { %745 = vmatpush.bf16.msrb.mxu2 %v2012_v38  ;;  %v2765_v56 = vld [vmem:[%s4221_s2 + $0x1c4] sm:$0xf]  ;;  %v2233_v57 = vld [vmem:[%s4221_s2 + $0x1c8] sm:$0xf0]  ;;  %v2172_v62 = vor.u32 %v2749_v52, %v2169_v54  ;;  %v2369_v1 = vld [vmem:[%s4221_s2 + $0x2d8] sm:$0xf0] }
  0x4c   :  { %759 = vmatpush.bf16.msrb.mxu3 %v2076_v42  ;;  %v2236_v0 = vor.u32 %v2765_v56, %v2233_v57  ;;  %v2747_v2 = vld [vmem:[%s4221_s2 + $0x134] sm:$0xf]  ;;  %v2161_v3 = vld [vmem:[%s4221_s2 + $0x138] sm:$0xf0]  ;;  %v2372_v7 = vor.u32 %v2799_v63, %v2369_v1  ;;  %v2781_v8 = vld [vmem:[%s4221_s2 + $0x244] sm:$0xf] }
  0x4d   :  { %768 = vmatpush.bf16.msra.mxu0 %v2180_v46  ;;  %v2763_v4 = vld [vmem:[%s4221_s2 + $0x1b4] sm:$0xf]  ;;  %v2225_v5 = vld [vmem:[%s4221_s2 + $0x1b8] sm:$0xf0]  ;;  %v2164_v9 = vor.u32 %v2747_v2, %v2161_v3  ;;  %v2797_v10 = vld [vmem:[%s4221_s2 + $0x2c4] sm:$0xf] }
  0x4e   :  { %782 = vmatpush.bf16.msra.mxu1 %v2244_v49  ;;  %746 = vmatmul.bf16.vlgmr.msrb.gmra.mxu2 %v3259_v48  ;;  %v2297_v48 = vld [vmem:[%s4221_s2 + $0x248] sm:$0xf0]  ;;  %v2745_v12 = vld [vmem:[%s4221_s2 + $0x124] sm:$0xf]  ;;  %v2779_v18 = vld [vmem:[%s4221_s2 + $0x234] sm:$0xf] }
  0x4f   :  { %794 = vmatpush.bf16.msra.mxu2 %v2324_v41  ;;  %760 = vmatmul.bf16.vlgmr.msrb.gmra.mxu3 %v3267_v51  ;;  %v2228_v51 = vor.u32 %v2763_v4, %v2225_v5  ;;  %v2361_v11 = vld [vmem:[%s4221_s2 + $0x2c8] sm:$0xf0]  ;;  %v2761_v14 = vld [vmem:[%s4221_s2 + $0x1a4] sm:$0xf]  ;;  %v2300_v16 = vor.u32 %v2781_v8, %v2297_v48  ;;  %v2289_v19 = vld [vmem:[%s4221_s2 + $0x238] sm:$0xf0] }
  0x50   :  { %808 = vmatpush.bf16.msra.mxu3 %v2388_v43  ;;  %v2153_v13 = vld [vmem:[%s4221_s2 + $0x128] sm:$0xf0]  ;;  %v2364_v17 = vor.u32 %v2797_v10, %v2361_v11  ;;  %v2292_v23 = vor.u32 %v2779_v18, %v2289_v19  ;;  %v2795_v24 = vld [vmem:[%s4221_s2 + $0x2b4] sm:$0xf]  ;;  %v2353_v25 = vld [vmem:[%s4221_s2 + $0x2b8] sm:$0xf0] }
  0x51   :  { %769 = vmatpush.bf16.msra.mxu0 %v2172_v62  ;;  %v2217_v15 = vld [vmem:[%s4221_s2 + $0x1a8] sm:$0xf0]  ;;  %v2156_v20 = vor.u32 %v2745_v12, %v2153_v13  ;;  %v2356_v26 = vor.u32 %v2795_v24, %v2353_v25  ;;  %v2777_v27 = vld [vmem:[%s4221_s2 + $0x224] sm:$0xf]  ;;  %v2743_v30 = vld [vmem:[%s4221_s2 + $0x114] sm:$0xf] }
  0x52   :  { %783 = vmatpush.bf16.msra.mxu1 %v2236_v0  ;;  %v2220_v21 = vor.u32 %v2761_v14, %v2217_v15  ;;  %v2281_v28 = vld [vmem:[%s4221_s2 + $0x228] sm:$0xf0]  ;;  %v2145_v32 = vld [vmem:[%s4221_s2 + $0x118] sm:$0xf0]  ;;  %v2759_v33 = vld [vmem:[%s4221_s2 + $0x194] sm:$0xf] }
  0x53   :  { %795 = vmatpush.bf16.msra.mxu2 %v2316_v58  ;;  %v2284_v31 = vor.u32 %v2777_v27, %v2281_v28  ;;  %v2209_v34 = vld [vmem:[%s4221_s2 + $0x198] sm:$0xf0]  ;;  %v2148_v35 = vor.u32 %v2743_v30, %v2145_v32  ;;  %v2793_v37 = vld [vmem:[%s4221_s2 + $0x2a4] sm:$0xf]  ;;  %v2345_v38 = vld [vmem:[%s4221_s2 + $0x2a8] sm:$0xf0] }
  0x54   :  { %809 = vmatpush.bf16.msra.mxu3 %v2380_v59  ;;  %v2212_v36 = vor.u32 %v2759_v33, %v2209_v34  ;;  %v2348_v39 = vor.u32 %v2793_v37, %v2345_v38  ;;  %v2775_v40 = vld [vmem:[%s4221_s2 + $0x214] sm:$0xf]  ;;  %v2273_v41 = vld [vmem:[%s4221_s2 + $0x218] sm:$0xf0]  ;;  %v2741_v43 = vld [vmem:[%s4221_s2 + $0x104] sm:$0xf] }
  0x55   :  { %770 = vmatpush.bf16.msra.mxu0 %v2164_v9  ;;  %v2276_v42 = vor.u32 %v2775_v40, %v2273_v41  ;;  %v2137_v44 = vld [vmem:[%s4221_s2 + $0x108] sm:$0xf0]  ;;  %v2757_v45 = vld [vmem:[%s4221_s2 + $0x184] sm:$0xf]  ;;  %v2791_v49 = vld [vmem:[%s4221_s2 + $0x294] sm:$0xf] }
  0x56   :  { %784 = vmatpush.bf16.msra.mxu1 %v2228_v51  ;;  %v2140_v46 = vor.u32 %v2741_v43, %v2137_v44  ;;  %v2201_v47 = vld [vmem:[%s4221_s2 + $0x188] sm:$0xf0]  ;;  %v2337_v50 = vld [vmem:[%s4221_s2 + $0x298] sm:$0xf0]  ;;  %v2447_v56 = vld [vmem:[%s4223_s4 + $0x70] sm:$0xf] }
  0x57   :  { %796 = vmatpush.bf16.msra.mxu2 %v2308_v6  ;;  %v2204_v52 = vor.u32 %v2757_v45, %v2201_v47  ;;  %v2340_v54 = vor.u32 %v2791_v49, %v2337_v50  ;;  %v2820_v57 = vld [vmem:[%s4223_s4 + $0x74] sm:$0xf0]  ;;  %v2819_v58 = vld [vmem:[%s4223_s4 + $0x74] sm:$0xf]  ;;  %v2449_v60 = vld [vmem:[%s4223_s4 + $0x78] sm:$0xf0] }
  0x58   :  { %810 = vmatpush.bf16.msra.mxu3 %v2372_v7  ;;  %v2448_v59 = vor.u32 %v2820_v57, %v2447_v56  ;;  %v2773_v61 = vld [vmem:[%s4221_s2 + $0x204] sm:$0xf]  ;;  %v2265_v62 = vld [vmem:[%s4221_s2 + $0x208] sm:$0xf0]  ;;  %v2452_v63 = vor.u32 %v2819_v58, %v2449_v60  ;;  %v2439_v3 = vld [vmem:[%s4223_s4 + $0x60] sm:$0xf] }
  0x59   :  { %771 = vmatpush.bf16.msra.mxu0 %v2156_v20  ;;  %v2268_v0 = vor.u32 %v2773_v61, %v2265_v62  ;;  %v2789_v1 = vld [vmem:[%s4221_s2 + $0x284] sm:$0xf]  ;;  %v2329_v2 = vld [vmem:[%s4221_s2 + $0x288] sm:$0xf0]  ;;  %v2818_v5 = vld [vmem:[%s4223_s4 + $0x64] sm:$0xf0] }
  0x5a   :  { %785 = vmatpush.bf16.msra.mxu1 %v2220_v21  ;;  %v2332_v4 = vor.u32 %v2789_v1, %v2329_v2  ;;  %v2817_v6 = vld [vmem:[%s4223_s4 + $0x64] sm:$0xf]  ;;  %v2441_v7 = vld [vmem:[%s4223_s4 + $0x68] sm:$0xf0]  ;;  %v2440_v8 = vor.u32 %v2818_v5, %v2439_v3  ;;  %v2431_v9 = vld [vmem:[%s4223_s4 + $0x50] sm:$0xf] }
  0x5b   :  { %797 = vmatpush.bf16.msra.mxu2 %v2300_v16  ;;  %v2444_v48 = vor.u32 %v2817_v6, %v2441_v7  ;;  %v2816_v10 = vld [vmem:[%s4223_s4 + $0x54] sm:$0xf0]  ;;  %v2815_v51 = vld [vmem:[%s4223_s4 + $0x54] sm:$0xf]  ;;  %v2814_v11 = vld [vmem:[%s4223_s4 + $0x44] sm:$0xf0] }
  0x5c   :  { %811 = vmatpush.bf16.msra.mxu3 %v2364_v17  ;;  %v2813_v13 = vld [vmem:[%s4223_s4 + $0x44] sm:$0xf]  ;;  %v2425_v14 = vld [vmem:[%s4223_s4 + $0x48] sm:$0xf0]  ;;  %v2415_v17 = vld [vmem:[%s4223_s4 + $0x30] sm:$0xf] }
  0x5d   :  { %772 = vmatpush.bf16.msra.mxu0 %v2148_v35  ;;  %v2428_v16 = vor.u32 %v2813_v13, %v2425_v14  ;;  %v2811_v18 = vld [vmem:[%s4223_s4 + $0x34] sm:$0xf]  ;;  %v2417_v20 = vld [vmem:[%s4223_s4 + $0x38] sm:$0xf0]  ;;  %v2810_v24 = vld [vmem:[%s4223_s4 + $0x24] sm:$0xf0] }
  0x5e   :  { %786 = vmatpush.bf16.msra.mxu1 %v2212_v36  ;;  %v2420_v21 = vor.u32 %v2811_v18, %v2417_v20  ;;  %v2809_v25 = vld [vmem:[%s4223_s4 + $0x24] sm:$0xf]  ;;  %v2409_v27 = vld [vmem:[%s4223_s4 + $0x28] sm:$0xf0]  ;;  %v2399_v30 = vld [vmem:[%s4223_s4 + $0x10] sm:$0xf] }
  0x5f   :  { %798 = vmatpush.bf16.msra.mxu2 %v2292_v23  ;;  %v2407_v23 = vld [vmem:[%s4223_s4 + $0x20] sm:$0xf]  ;;  %v2412_v28 = vor.u32 %v2809_v25, %v2409_v27  ;;  %v2807_v32 = vld [vmem:[%s4223_s4 + $0x14] sm:$0xf]  ;;  %v2401_v34 = vld [vmem:[%s4223_s4 + $0x18] sm:$0xf0] }
  0x60   :  { %812 = vmatpush.bf16.msra.mxu3 %v2356_v26  ;;  %v2408_v26 = vor.u32 %v2810_v24, %v2407_v23  ;;  %v2404_v35 = vor.u32 %v2807_v32, %v2401_v34  ;;  %v2391_v36 = vld [vmem:[%s4223_s4] sm:$0xf]  ;;  %v2806_v37 = vld [vmem:[%s4223_s4 + $0x4] sm:$0xf0]  ;;  %v2805_v38 = vld [vmem:[%s4223_s4 + $0x4] sm:$0xf] }
  0x61   :  { %773 = vmatpush.bf16.msra.mxu0 %v2140_v46  ;;  %v2393_v40 = vld [vmem:[%s4223_s4 + $0x8] sm:$0xf0]  ;;  %v168_v44 = vld [vmem:[%s4222_s3] sm:$0x3]  ;;  %v2836_v32 = vld [vmem:[%s4225_s6 + $0x78] sm:$0xff] }
  0x62   :  { %787 = vmatpush.bf16.msra.mxu1 %v2204_v52  ;;  %v2396_v41 = vor.u32 %v2805_v38, %v2393_v40  ;;  %v170_v45 = vperm.slane %v168_v44, 0  ;;  %v2835_v34 = vld [vmem:[%s4225_s6 + $0x70] sm:$0xff]  ;;  %v2825_v40 = vld [vmem:[%s4225_s6 + $0x20] sm:$0xff] }
  0x63   :  { %799 = vmatpush.bf16.msra.mxu2 %v2284_v31  ;;  %v2808_v31 = vld [vmem:[%s4223_s4 + $0x14] sm:$0xf0] }
  0x64   :  { %813 = vmatpush.bf16.msra.mxu3 %v2348_v39  ;;  %774 = vmatmul.bf16.vlgmr.msra.gmra.mxu0 %v3269_v53  ;;  %v2432_v53 = vor.u32 %v2816_v10, %v2431_v9  ;;  %v2400_v33 = vor.u32 %v2808_v31, %v2399_v30  ;;  %v2392_v39 = vor.u32 %v2806_v37, %v2391_v36  ;;  %v171_v9 = vperm.slane %v168_v44, 1  ;;  %v2828_v31 = vld [vmem:[%s4225_s6 + $0x38] sm:$0xff]  ;;  %v2826_v36 = vld [vmem:[%s4225_s6 + $0x28] sm:$0xff] }
  0x65   :  { %927 = vmatpush.bf16.msrb.mxu0 %v2448_v59  ;;  %788 = vmatmul.bf16.vlgmr.msra.gmra.mxu1 %v3271_v55  ;;  %v2433_v55 = vld [vmem:[%s4223_s4 + $0x58] sm:$0xf0]  ;;  %v2834_v37 = vld [vmem:[%s4225_s6 + $0x68] sm:$0xff] }
  0x66   :  { %941 = vmatpush.bf16.msrb.mxu1 %v2452_v63  ;;  %v2436_v12 = vor.u32 %v2815_v51, %v2433_v55  ;;  %v2824_v44 = vld [vmem:[%s4225_s6 + $0x18] sm:$0xff] }
  0x67   :  { %800 = vmatpush.bf16.msra.mxu2 %v2276_v42 }
  0x68   :  { %814 = vmatpush.bf16.msra.mxu3 %v2340_v54 }
  0x69   :  { %928 = vmatpush.bf16.msrb.mxu0 %v2440_v8 }
  0x6a   :  { %942 = vmatpush.bf16.msrb.mxu1 %v2444_v48 }
  0x6b   :  { %801 = vmatpush.bf16.msra.mxu2 %v2268_v0 }
  0x6c   :  { %815 = vmatpush.bf16.msra.mxu3 %v2332_v4 }
  0x6d   :  { %929 = vmatpush.bf16.msrb.mxu0 %v2432_v53 }
  0x6e   :  { %802 = vmatmul.bf16.vlgmr.msra.gmra.mxu2 %v3469_v22  ;;  %v2423_v22 = vld [vmem:[%s4223_s4 + $0x40] sm:$0xf]  ;;  %943 = vmatpush.bf16.msrb.mxu1 %v2436_v12 }
  0x6f   :  { %816 = vmatmul.bf16.vlgmr.msra.gmra.mxu3 %v3486_v29  ;;  %v2424_v15 = vor.u32 %v2814_v11, %v2423_v22  ;;  %v2812_v29 = vld [vmem:[%s4223_s4 + $0x34] sm:$0xf0]  ;;  %1233 = vmatpush.bf16.msrb.mxu2 %v2828_v31 }
  0x70   :  { %v2416_v19 = vor.u32 %v2812_v29, %v2415_v17  ;;  %1247 = vmatpush.bf16.msrb.mxu3 %v2836_v32 }
  0x71   :  { %930 = vmatpush.bf16.msrb.mxu0 %v2424_v15 }
  0x72   :  { %944 = vmatpush.bf16.msrb.mxu1 %v2428_v16 }
  0x74   :  { %1248 = vmatpush.bf16.msrb.mxu3 %v2835_v34 }
  0x75   :  { %931 = vmatpush.bf16.msrb.mxu0 %v2416_v19 }
  0x76   :  { %945 = vmatpush.bf16.msrb.mxu1 %v2420_v21 }
  0x78   :  { %1249 = vmatpush.bf16.msrb.mxu3 %v2834_v37 }
  0x79   :  { %932 = vmatpush.bf16.msrb.mxu0 %v2408_v26 }
  0x7a   :  { %946 = vmatpush.bf16.msrb.mxu1 %v2412_v28 }
  0x7d   :  { %933 = vmatpush.bf16.msrb.mxu0 %v2400_v33  ;;  %v2827_v33 = vld [vmem:[%s4225_s6 + $0x30] sm:$0xff] }
  0x7e   :  { %947 = vmatpush.bf16.msrb.mxu1 %v2404_v35  ;;  %1234 = vmatpush.bf16.msrb.mxu2 %v2827_v33  ;;  %v3777_v35 = vld [vmem:[%s4224_s5] sm:$0x77] }
  0x7f   :  { %v841_v38 = vperm.slane %v3777_v35, 0 }
  0x81   :  { %934 = vmatpush.bf16.msrb.mxu0 %v2392_v39  ;;  %v842_v39 = vperm.slane %v3777_v35, 4 }
  0x82   :  { %948 = vmatpush.bf16.msrb.mxu1 %v2396_v41  ;;  %1235 = vmatpush.bf16.msrb.mxu2 %v2826_v36  ;;  %v2833_v41 = vld [vmem:[%s4225_s6 + $0x60] sm:$0xff] }
  0x83   :  { %1250 = vmatpush.bf16.msrb.mxu3 %v2833_v41 }
  0x86   :  { %1236 = vmatpush.bf16.msrb.mxu2 %v2825_v40 }
  0x8a   :  { %1237 = vmatpush.bf16.msrb.mxu2 %v2824_v44  ;;  %v2641_v44 = vld [vmem:[%s4227_s8 + $0x78] sm:$0xf0] }
  0xa1   :  { %v663_v42 = vpop.f32.mrf.mxu0 }
  0xa2   :  { %v677_v43 = vpop.f32.mrf.mxu1  ;;  %v664_v49 = vadd.f32 %v663_v42, %v170_v45  ;;  %v845_v42 = vperm.slane %v841_v38, 0  ;;  %v2639_v38 = vld [vmem:[%s4227_s8 + $0x70] sm:$0xf] }
  0xa4   :  { %v678_v56 = vadd.f32 %v677_v43, %v664_v49  ;;  %v846_v43 = vperm.slane %v842_v39, 0  ;;  %v2868_v39 = vld [vmem:[%s4227_s8 + $0x74] sm:$0xf0] }
  0xa9   :  { %v691_v46 = vpop.f32.mrf.mxu2  ;;  %v665_v47 = vpop.f32.mrf.mxu0 }
  0xaa   :  { %v679_v50 = vpop.f32.mrf.mxu1  ;;  %v705_v52 = vpop.f32.mrf.mxu3  ;;  %v666_v54 = vadd.f32 %v665_v47, %v170_v45  ;;  %v692_v60 = vadd.f32 %v691_v46, %v678_v56  ;;  %v2832_v45 = vld [vmem:[%s4225_s6 + $0x58] sm:$0xff] }
  0xab   :  { %1251 = vmatpush.bf16.msrb.mxu3 %v2832_v45 }
  0xac   :  { %v680_v57 = vadd.f32 %v679_v50, %v666_v54  ;;  %v706_v0 = vadd.f32 %v705_v52, %v692_v60 }
  0xb1   :  { %v693_v58 = vpop.f32.mrf.mxu2 }
  0xb2   :  { %v694_v62 = vadd.f32 %v693_v58, %v680_v57  ;;  %v707_v63 = vpop.f32.mrf.mxu3  ;;  %v2823_v58 = vld [vmem:[%s4225_s6 + $0x10] sm:$0xff] }
  0xb3   :  { %1238 = vmatpush.bf16.msrb.mxu2 %v2823_v58 }
  0xb4   :  { %v708_v1 = vadd.f32 %v707_v63, %v694_v62 }
  0xc4   :  { %v719_v59 = vpop.f32.mrf.mxu0 }
  0xc5   :  { %v733_v61 = vpop.f32.mrf.mxu1  ;;  %v720_v2 = vadd.f32 %v719_v59, %v706_v0  ;;  %v2831_v59 = vld [vmem:[%s4225_s6 + $0x50] sm:$0xff] }
  0xc6   :  { %1252 = vmatpush.bf16.msrb.mxu3 %v2831_v59  ;;  %v2640_v59 = vor.u32 %v2868_v39, %v2639_v38 }
  0xc7   :  { %v734_v6 = vadd.f32 %v733_v61, %v720_v2 }
  0xcc   :  { %v721_v3 = vpop.f32.mrf.mxu0 }
  0xcd   :  { %v722_v4 = vadd.f32 %v721_v3, %v708_v1  ;;  %v735_v5 = vpop.f32.mrf.mxu1 }
  0xcf   :  { %v736_v7 = vadd.f32 %v735_v5, %v722_v4  ;;  %v2822_v4 = vld [vmem:[%s4225_s6 + $0x8] sm:$0xff] }
  0xd0   :  { %v2830_v5 = vld [vmem:[%s4225_s6 + $0x48] sm:$0xff]  ;;  %1239 = vmatpush.bf16.msrb.mxu2 %v2822_v4 }
  0xd1   :  { %v823_v8 = vpack.c.bf16 %v736_v7, %v734_v6  ;;  %v747_v48 = vpop.f32.mrf.mxu2  ;;  %1253 = vmatpush.bf16.msrb.mxu3 %v2830_v5 }
  0xd2   :  { %v761_v10 = vpop.f32.mrf.mxu3  ;;  %v748_v51 = vadd.f32 %v747_v48, %v171_v9 }
  0xd3   :  { %935 = vmatmul.bf16.vlgmr.msrb.gmra.mxu0 %v823_v8  ;;  %949 = vmatmul.bf16.vlgmr.msrb.gmra.mxu1 %v823_v8 }
  0xd4   :  { %v762_v53 = vadd.f32 %v761_v10, %v748_v51 }
  0xd9   :  { %v749_v55 = vpop.f32.mrf.mxu2 }
  0xda   :  { %v763_v22 = vpop.f32.mrf.mxu3  ;;  %v750_v13 = vadd.f32 %v749_v55, %v171_v9 }
  0xdc   :  { %v764_v16 = vadd.f32 %v763_v22, %v750_v13  ;;  %v2821_v13 = vld [vmem:[%s4225_s6] sm:$0xff] }
  0xdd   :  { %1240 = vmatpush.bf16.msrb.mxu2 %v2821_v13 }
  0xe1   :  { %v775_v11 = vpop.f32.mrf.mxu0  ;;  %1598 = vmatpush.bf16.msra.mxu2 %v2640_v59 }
  0xe2   :  { %v789_v12 = vpop.f32.mrf.mxu1  ;;  %v776_v14 = vadd.f32 %v775_v11, %v762_v53 }
  0xe4   :  { %v790_v15 = vadd.f32 %v789_v12, %v776_v14  ;;  %v2829_v14 = vld [vmem:[%s4225_s6 + $0x40] sm:$0xff] }
  0xe5   :  { %1254 = vmatpush.bf16.msrb.mxu3 %v2829_v14 }
  0xe9   :  { %v777_v29 = vpop.f32.mrf.mxu0 }
  0xea   :  { %v778_v18 = vadd.f32 %v777_v29, %v764_v16  ;;  %v791_v19 = vpop.f32.mrf.mxu1 }
  0xec   :  { %v792_v21 = vadd.f32 %v791_v19, %v778_v18 }
  0xf1   :  { %v803_v17 = vpop.f32.mrf.mxu2 }
  0xf2   :  { %v817_v20 = vpop.f32.mrf.mxu3  ;;  %v804_v23 = vadd.f32 %v803_v17, %v790_v15 }
  0xf4   :  { %v818_v25 = vadd.f32 %v817_v20, %v804_v23 }
  0xf9   :  { %v805_v24 = vpop.f32.mrf.mxu2 }
  0xfa   :  { %v806_v26 = vadd.f32 %v805_v24, %v792_v21  ;;  %v819_v27 = vpop.f32.mrf.mxu3 }
  0xfc   :  { %v820_v28 = vadd.f32 %v819_v27, %v806_v26 }
  0xfe   :  { %v3760_v30 = vpack.c.bf16 %v820_v28, %v818_v25 }
 0x150   :  { %v936_v46 = vpop.f32.mrf.mxu0  ;;  %v950_v47 = vpop.f32.mrf.mxu1 }
 0x151   :  { %v3799_v49 = vadd.f32 %v936_v46, %v845_v42  ;;  %v3801_v50 = vadd.f32 %v950_v47, %v846_v43 }
 0x153   :  { %v955_v52 = vrot.slane %v3799_v49, 4  ;;  %v983_v54 = vmul.f32 %v3799_v49, %v3799_v49  ;;  %v961_v56 = vrot.slane %v3801_v50, 4  ;;  %v984_v57 = vmul.f32 %v3801_v50, %v3801_v50 }
 0x155   :  { %v956_v60 = vadd.f32 %v955_v52, %v3799_v49  ;;  %v987_v61 = vrot.slane %v983_v54, 4  ;;  %v962_v62 = vadd.f32 %v961_v56, %v3801_v50  ;;  %v993_v63 = vrot.slane %v984_v57, 4  ;;  %v2631_v52 = vld [vmem:[%s4227_s8 + $0x60] sm:$0xf] }
 0x157   :  { %v957_v0 = vrot.slane %v956_v60, 2  ;;  %v988_v1 = vadd.f32 %v987_v61, %v983_v54  ;;  %v963_v2 = vrot.slane %v962_v62, 2  ;;  %v994_v3 = vadd.f32 %v993_v63, %v984_v57  ;;  %v2866_v54 = vld [vmem:[%s4227_s8 + $0x64] sm:$0xf0]  ;;  %v2633_v61 = vld [vmem:[%s4227_s8 + $0x68] sm:$0xf0] }
 0x158   :  { %v938_v6 = vpop.f32.mrf.mxu0  ;;  %v952_v7 = vpop.f32.mrf.mxu1  ;;  %v2632_v5 = vor.u32 %v2866_v54, %v2631_v52 }
 0x159   :  { %v958_v8 = vadd.f32 %v957_v0, %v956_v60  ;;  %v989_v48 = vrot.slane %v988_v1, 2  ;;  %v964_v9 = vadd.f32 %v963_v2, %v962_v62  ;;  %v995_v10 = vrot.slane %v994_v3, 2  ;;  %v2865_v60 = vld [vmem:[%s4227_s8 + $0x64] sm:$0xf] }
 0x15a   :  { %v3823_v51 = vadd.f32 %v938_v6, %v845_v42  ;;  %v3825_v53 = vadd.f32 %v952_v7, %v846_v43  ;;  %v2867_v43 = vld [vmem:[%s4227_s8 + $0x74] sm:$0xf]  ;;  %v2623_v6 = vld [vmem:[%s4227_s8 + $0x50] sm:$0xf]  ;;  %1599 = vmatpush.bf16.msra.mxu2 %v2632_v5 }
 0x15b   :  { %v959_v55 = vrot.slane %v958_v8, 1  ;;  %v990_v22 = vadd.f32 %v989_v48, %v988_v1  ;;  %v965_v11 = vrot.slane %v964_v9, 1  ;;  %v996_v12 = vadd.f32 %v995_v10, %v994_v3  ;;  %v2864_v10 = vld [vmem:[%s4227_s8 + $0x54] sm:$0xf0] }
 0x15c   :  { %v967_v15 = vrot.slane %v3823_v51, 4  ;;  %v985_v16 = vmul.f32 %v3823_v51, %v3823_v51  ;;  %v973_v17 = vrot.slane %v3825_v53, 4  ;;  %v986_v29 = vmul.f32 %v3825_v53, %v3825_v53 }
 0x15d   :  { %v960_v18 = vadd.f32 %v959_v55, %v958_v8  ;;  %v991_v19 = vrot.slane %v990_v22, 1  ;;  %v966_v20 = vadd.f32 %v965_v11, %v964_v9  ;;  %v997_v21 = vrot.slane %v996_v12, 1  ;;  %v2863_v11 = vld [vmem:[%s4227_s8 + $0x54] sm:$0xf] }
 0x15e   :  { %v968_v23 = vadd.f32 %v967_v15, %v3823_v51  ;;  %v999_v24 = vrot.slane %v985_v16, 4  ;;  %v974_v25 = vadd.f32 %v973_v17, %v3825_v53  ;;  %v1005_v26 = vrot.slane %v986_v29, 4 }
 0x15f   :  { %v3841_v27 = vmul.f32 0.125, %v960_v18  ;;  %v992_v28 = vadd.f32 %v991_v19, %v990_v22  ;;  %v3843_v31 = vmul.f32 0.125, %v966_v20  ;;  %v998_v32 = vadd.f32 %v997_v21, %v996_v12  ;;  %v2625_v12 = vld [vmem:[%s4227_s8 + $0x58] sm:$0xf0]  ;;  %v2615_v20 = vld [vmem:[%s4227_s8 + $0x40] sm:$0xf] }
 0x160   :  { %v969_v33 = vrot.slane %v968_v23, 2  ;;  %v1000_v34 = vadd.f32 %v999_v24, %v985_v16  ;;  %v975_v36 = vrot.slane %v974_v25, 2  ;;  %v1006_v37 = vadd.f32 %v1005_v26, %v986_v29  ;;  %v2862_v21 = vld [vmem:[%s4227_s8 + $0x44] sm:$0xf0]  ;;  %v2617_v26 = vld [vmem:[%s4227_s8 + $0x48] sm:$0xf0] }
 0x161   :  { %v1011_v40 = vmul.f32 0.125, %v992_v28  ;;  %v1015_v41 = vmul.f32 %v3841_v27, %v3841_v27  ;;  %v1012_v42 = vmul.f32 0.125, %v998_v32  ;;  %v1016_v45 = vmul.f32 %v3843_v31, %v3843_v31 }
 0x162   :  { %v970_v46 = vadd.f32 %v969_v33, %v968_v23  ;;  %v1001_v47 = vrot.slane %v1000_v34, 2  ;;  %v976_v57 = vadd.f32 %v975_v36, %v974_v25  ;;  %v1007_v58 = vrot.slane %v1006_v37, 2  ;;  %v2861_v25 = vld [vmem:[%s4227_s8 + $0x44] sm:$0xf] }
 0x163   :  { %v1019_v56 = vsub.f32 %v1011_v40, %v1015_v41  ;;  %v1020_v62 = vsub.f32 %v1012_v42, %v1016_v45  ;;  %v2644_v1 = vor.u32 %v2867_v43, %v2641_v44  ;;  %v2636_v9 = vor.u32 %v2865_v60, %v2633_v61  ;;  %v2607_v40 = vld [vmem:[%s4227_s8 + $0x30] sm:$0xf]  ;;  %v2860_v41 = vld [vmem:[%s4227_s8 + $0x34] sm:$0xf0]  ;;  %v2859_v44 = vld [vmem:[%s4227_s8 + $0x34] sm:$0xf] }
 0x164   :  { %v971_v63 = vrot.slane %v970_v46, 1  ;;  %v1002_v0 = vadd.f32 %v1001_v47, %v1000_v34  ;;  %v977_v3 = vrot.slane %v976_v57, 1  ;;  %v1008_v4 = vadd.f32 %v1007_v58, %v1006_v37  ;;  %v2609_v45 = vld [vmem:[%s4227_s8 + $0x38] sm:$0xf0]  ;;  %v2858_v58 = vld [vmem:[%s4227_s8 + $0x24] sm:$0xf0] }
 0x165   :  { %v3873_v2 = vadd.f32 1e-05, %v1019_v56  ;;  %v3878_v7 = vadd.f32 1e-05, %v1020_v62  ;;  %1612 = vmatpush.bf16.msra.mxu3 %v2644_v1  ;;  %v2624_v17 = vor.u32 %v2864_v10, %v2623_v6  ;;  %v2628_v19 = vor.u32 %v2863_v11, %v2625_v12  ;;  %v2857_v60 = vld [vmem:[%s4227_s8 + $0x24] sm:$0xf] }
 0x166   :  { %v972_v8 = vadd.f32 %v971_v63, %v970_v46  ;;  %v1003_v48 = vrot.slane %v1002_v0, 1  ;;  %v978_v55 = vadd.f32 %v977_v3, %v976_v57  ;;  %v1009_v22 = vrot.slane %v1008_v4, 1  ;;  %v2599_v57 = vld [vmem:[%s4227_s8 + $0x20] sm:$0xf]  ;;  %v2601_v61 = vld [vmem:[%s4227_s8 + $0x28] sm:$0xf0] }
 0x167   :  { %2889 = vrsqrt.f32 %v3873_v2  ;;  %1600 = vmatpush.bf16.msra.mxu2 %v2624_v17  ;;  %v2616_v34 = vor.u32 %v2862_v21, %v2615_v20  ;;  %v2620_v39 = vor.u32 %v2861_v25, %v2617_v26  ;;  %v2608_v52 = vor.u32 %v2860_v41, %v2607_v40  ;;  %v2591_v6 = vld [vmem:[%s4227_s8 + $0x10] sm:$0xf]  ;;  %v2583_v20 = vld [vmem:[%s4227_s8] sm:$0xf]  ;;  %v2854_v21 = vld [vmem:[%s4227_s8 + $0x4] sm:$0xf0] }
 0x168   :  { %2891 = vrsqrt.f32 %v3878_v7  ;;  %v3891_v13 = vmul.f32 0.125, %v972_v8  ;;  %v1004_v14 = vadd.f32 %v1003_v48, %v1002_v0  ;;  %v3893_v15 = vmul.f32 0.125, %v978_v55  ;;  %v2856_v8 = vld [vmem:[%s4227_s8 + $0x14] sm:$0xf0]  ;;  %v2855_v55 = vld [vmem:[%s4227_s8 + $0x14] sm:$0xf] }
 0x169   :  { %v1010_v16 = vadd.f32 %v1009_v22, %v1008_v4  ;;  %1613 = vmatpush.bf16.msra.mxu3 %v2636_v9  ;;  %v2612_v56 = vor.u32 %v2859_v44, %v2609_v45  ;;  %v2600_v0 = vor.u32 %v2858_v58, %v2599_v57  ;;  %v1075_v4 = vperm.slane %v3777_v35, 1  ;;  %v2593_v22 = vld [vmem:[%s4227_s8 + $0x18] sm:$0xf0]  ;;  %v2853_v26 = vld [vmem:[%s4227_s8 + $0x4] sm:$0xf] }
 0x16a   :  { %v1013_v29 = vmul.f32 0.125, %v1004_v14  ;;  %v1017_v18 = vmul.f32 %v3891_v13, %v3891_v13  ;;  %v1018_v24 = vmul.f32 %v3893_v15, %v3893_v15  ;;  %v2604_v5 = vor.u32 %v2857_v60, %v2601_v61 }
 0x16b   :  { %v1014_v23 = vmul.f32 0.125, %v1010_v16  ;;  %1601 = vmatpush.bf16.msra.mxu2 %v2616_v34  ;;  %vm1037_vm2 = vweird.f32 %v3873_v2  ;;  %vm1047_vm4 = vweird.f32 %v3878_v7  ;;  %v1076_v12 = vperm.slane %v3777_v35, 5 }
 0x16c   :  { %v1021_v28 = vsub.f32 %v1013_v29, %v1017_v18  ;;  %v1023_v14 = vsub.f32 %v3799_v49, %v3841_v27  ;;  %v1079_v49 = vperm.slane %v1075_v4, 1  ;;  %v2596_v27 = vor.u32 %v2855_v55, %v2593_v22  ;;  %v2886_v55 = vld [vmem:[%s4226_s7] ss:$0 sm:$0xff]  ;;  %s1996_s7 = sshll.u32 %s4235_s16, 4  ;;  %s1997_s7 = int_to_ptr.hbm [resolvable:$true] %s1996_s7 }
 0x16d   :  { %v3911_v32 = vpop.eup %2889  ;;  %v1022_v33 = vsub.f32 %v1014_v23, %v1018_v24  ;;  %1614 = vmatpush.bf16.msra.mxu3 %v2628_v19  ;;  %v1024_v23 = vsub.f32 %v3801_v50, %v3843_v31  ;;  %v1085_v25 = vperm.slane %v3777_v35, 2  ;;  %v1080_v34 = vperm.slane %v1076_v12, 1  ;;  %v2844_v31 = vld [vmem:[%s4231_s12 + $0x38] sm:$0xff]  ;;  %v4055_v22 = vld [vmem:[%s4228_s9] sm:$0x77] }
 0x16e   :  { %v3913_v36 = vpop.eup %2891  ;;  %v1032_v37 = vmul.f32 %v3911_v32, %v3873_v2  ;;  %v3917_v38 = vadd.f32 1e-05, %v1021_v28  ;;  %vm1038_vm0 = vweird.f32 %v3911_v32  ;;  %v2585_v28 = vld [vmem:[%s4227_s8 + $0x8] sm:$0xf0]  ;;  %v2584_v50 = vor.u32 %v2854_v21, %v2583_v20  ;;  %1328 = vmatpush.bf16.msra.mxu0 %v2844_v31  ;;  %v2875_v20 = vld [vmem:[%s4229_s10 + $0x30] sm:$0xff] }
 0x16f   :  { %v1042_v42 = vmul.f32 %v3913_v36, %v3878_v7  ;;  %v3927_v43 = vadd.f32 1e-05, %v1022_v33  ;;  %1602 = vmatpush.bf16.msra.mxu2 %v2608_v52  ;;  %vm1048_vm1 = vweird.f32 %v3913_v36  ;;  %vm3975_vm3 = vmor %vm1037_vm2, %vm1038_vm0  ;;  %v2592_v7 = vor.u32 %v2856_v8, %v2591_v6  ;;  %v2840_v6 = vld [vmem:[%s4231_s12 + $0x18] sm:$0xff]  ;;  %v2839_v8 = vld [vmem:[%s4231_s12 + $0x10] sm:$0xff] }
 0x170   :  { %v1033_v46 = vmul.f32 %v3911_v32, %v1032_v37  ;;  %2893 = vrsqrt.f32 %v3917_v38  ;;  %vm3989_vm5 = vmor %vm1047_vm4, %vm1048_vm1  ;;  %v2588_v41 = vor.u32 %v2853_v26, %v2585_v28  ;;  %vm1057_vm8 = vweird.f32 %v3917_v38  ;;  %v2874_v26 = vld [vmem:[%s4229_s10 + $0x28] sm:$0xff] }
 0x171   :  { %v1043_v47 = vmul.f32 %v3913_v36, %v1042_v42  ;;  %2895 = vrsqrt.f32 %v3927_v43  ;;  %1615 = vmatpush.bf16.msra.mxu3 %v2620_v39  ;;  %v1025_v42 = vsub.f32 %v3823_v51, %v3891_v13  ;;  %vm1067_vm10 = vweird.f32 %v3927_v43 }
 0x172   :  { %v1034_v54 = vmul.f32 0.5, %v1033_v46  ;;  %v1026_v51 = vsub.f32 %v3825_v53, %v3893_v15  ;;  %v2841_v15 = vld [vmem:[%s4231_s12 + $0x20] sm:$0xff] }
 0x173   :  { %v1044_v59 = vmul.f32 0.5, %v1043_v47  ;;  %1603 = vmatpush.bf16.msra.mxu2 %v2600_v0  ;;  %v1089_v47 = vperm.slane %v1085_v25, 2 }
 0x174   :  { %v1035_v62 = vsub.f32 1.5, %v1034_v54 }
 0x175   :  { %v1045_v63 = vsub.f32 1.5, %v1044_v59  ;;  %1616 = vmatpush.bf16.msra.mxu3 %v2612_v56 }
 0x176   :  { %v3952_v1 = vpop.eup %2893  ;;  %v1036_v3 = vmul.f32 %v3911_v32, %v1035_v62 }
 0x177   :  { %v2896_v48 = vpop.eup %2895  ;;  %v1046_v9 = vmul.f32 %v3913_v36, %v1045_v63  ;;  %v1052_v10 = vmul.f32 %v3952_v1, %v3917_v38  ;;  %vm1058_vm6 = vweird.f32 %v3952_v1  ;;  %1604 = vmatpush.bf16.msra.mxu2 %v2592_v7 }
 0x178   :  { %v1062_v2 = vmul.f32 %v2896_v48, %v3927_v43  ;;  %v1040_v16 = vsel %vm3975_vm3, %v3911_v32, %v1036_v3  ;;  %vm1068_vm7 = vweird.f32 %v2896_v48  ;;  %vm1059_vm9 = vmor %vm1057_vm8, %vm1058_vm6  ;;  %v2842_v43 = vld [vmem:[%s4231_s12 + $0x28] sm:$0xff] }
 0x179   :  { %v1053_v29 = vmul.f32 %v3952_v1, %v1052_v10  ;;  %v1050_v18 = vsel %vm3989_vm5, %v3913_v36, %v1046_v9  ;;  %1617 = vmatpush.bf16.msra.mxu3 %v2604_v5  ;;  %v1071_v32 = vmul.f32 %v1040_v16, %v1023_v14  ;;  %v1086_v36 = vperm.slane %v3777_v35, 6  ;;  %v2843_v35 = vld [vmem:[%s4231_s12 + $0x30] sm:$0xff]  ;;  %vm1069_vm11 = vmor %vm1067_vm10, %vm1068_vm7  ;;  %v2837_v9 = vld [vmem:[%s4231_s12] sm:$0xff] }
 0x17a   :  { %v1063_v19 = vmul.f32 %v2896_v48, %v1062_v2  ;;  %v1072_v37 = vmul.f32 %v1050_v18, %v1024_v23  ;;  %1329 = vmatpush.bf16.msra.mxu0 %v2843_v35  ;;  %v1512_v14 = vperm.slane %v4055_v22, 0 }
 0x17b   :  { %v1054_v24 = vmul.f32 0.5, %v1053_v29  ;;  %v1081_v46 = vmul.f32 %v1079_v49, %v1071_v32  ;;  %v1090_v38 = vperm.slane %v1086_v36, 2  ;;  %1605 = vmatpush.bf16.msra.mxu2 %v2584_v50 }
 0x17c   :  { %v1064_v33 = vmul.f32 0.5, %v1063_v19  ;;  %v1082_v13 = vmul.f32 %v1080_v34, %v1072_v37  ;;  %v1516_v18 = vperm.slane %v1512_v14, 0  ;;  %v2876_v19 = vld [vmem:[%s4229_s10 + $0x38] sm:$0xff] }
 0x17d   :  { %v1055_v39 = vsub.f32 1.5, %v1054_v24  ;;  %1618 = vmatpush.bf16.msra.mxu3 %v2596_v27  ;;  %v1091_v59 = vadd.f32 %v1089_v47, %v1081_v46  ;;  %v2872_v46 = vld [vmem:[%s4229_s10 + $0x18] sm:$0xff] }
 0x17e   :  { %v1065_v40 = vsub.f32 1.5, %v1064_v33  ;;  %v1092_v61 = vadd.f32 %v1090_v38, %v1082_v13  ;;  %1330 = vmatpush.bf16.msra.mxu0 %v2842_v43  ;;  %v2871_v43 = vld [vmem:[%s4229_s10 + $0x10] sm:$0xff] }
 0x17f   :  { %v1056_v44 = vmul.f32 %v3952_v1, %v1055_v39  ;;  %v1095_v63 = vmax.f32 %v1091_v59, 0.0  ;;  %v2873_v39 = vld [vmem:[%s4229_s10 + $0x20] sm:$0xff] }
 0x180   :  { %v1066_v45 = vmul.f32 %v2896_v48, %v1065_v40 }
 0x181   :  { %v1060_v52 = vsel %vm1059_vm9, %v3952_v1, %v1056_v44  ;;  %1619 = vmatpush.bf16.msra.mxu3 %v2588_v41  ;;  %v1096_v1 = vmax.f32 %v1092_v61, 0.0  ;;  %v2870_v61 = vld [vmem:[%s4229_s10 + $0x8] sm:$0xff] }
 0x182   :  { %v1073_v54 = vmul.f32 %v1060_v52, %v1025_v42  ;;  %v1070_v56 = vsel %vm1069_vm11, %v2896_v48, %v1066_v45  ;;  %1331 = vmatpush.bf16.msra.mxu0 %v2841_v15  ;;  %v2838_v48 = vld [vmem:[%s4231_s12 + $0x8] sm:$0xff] }
 0x183   :  { %v1074_v57 = vmul.f32 %v1070_v56, %v1026_v51 }
 0x184   :  { %v1083_v58 = vmul.f32 %v1079_v49, %v1073_v54 }
 0x185   :  { %v1084_v60 = vmul.f32 %v1080_v34, %v1074_v57 }
 0x186   :  { %v1093_v62 = vadd.f32 %v1089_v47, %v1083_v58  ;;  %1332 = vmatpush.bf16.msra.mxu0 %v2840_v6 }
 0x187   :  { %v1094_v53 = vadd.f32 %v1090_v38, %v1084_v60 }
 0x188   :  { %v1097_v0 = vmax.f32 %v1093_v62, 0.0 }
 0x189   :  { %v1098_v3 = vmax.f32 %v1094_v53, 0.0 }
 0x18a   :  { %v1099_v4 = vpack.c.bf16 %v1097_v0, %v1095_v63  ;;  %1333 = vmatpush.bf16.msra.mxu0 %v2839_v8 }
 0x18b   :  { %v1100_v5 = vpack.c.bf16 %v1098_v3, %v1096_v1  ;;  %v2869_v1 = vld [vmem:[%s4229_s10] sm:$0xff] }
 0x18c   :  { %1241 = vmatmul.bf16.vlgmr.msrb.gmra.mxu2 %v1099_v4 }
 0x18d   :  { %1255 = vmatmul.bf16.vlgmr.msrb.gmra.mxu3 %v1100_v5 }
 0x18e   :  { %1334 = vmatpush.bf16.msra.mxu0 %v2838_v48 }
 0x192   :  { %1335 = vmatpush.bf16.msra.mxu0 %v2837_v9 }
 0x196   :  { %1904 = vmatpush.bf16.msrb.mxu0 %v2876_v19  ;;  %v1756_v19 = vperm.slane %v4055_v22, 2 }
 0x19a   :  { %1905 = vmatpush.bf16.msrb.mxu0 %v2875_v20 }
 0x19c   :  { %1606 = vmatmul.bf16.vlgmr.msra.gmra.mxu2 %v3760_v30 }
 0x19d   :  { %1620 = vmatmul.bf16.vlgmr.msra.gmra.mxu3 %v3760_v30 }
 0x19e   :  { %1906 = vmatpush.bf16.msrb.mxu0 %v2874_v26 }
 0x1a2   :  { %1907 = vmatpush.bf16.msrb.mxu0 %v2873_v39 }
 0x1a6   :  { %1908 = vmatpush.bf16.msrb.mxu0 %v2872_v46 }
 0x1aa   :  { %1909 = vmatpush.bf16.msrb.mxu0 %v2871_v43  ;;  %v4123_v43 = vld [vmem:[%s4232_s13] sm:$0x7] }
 0x1ae   :  { %1910 = vmatpush.bf16.msrb.mxu0 %v2870_v61  ;;  %v2849_v61 = vld [vmem:[%s4233_s14 + $0x20] sm:$0xff] }
 0x1b2   :  { %1911 = vmatpush.bf16.msrb.mxu0 %v2869_v1 }
 0x20f   :  { %v1242_v30 = vpop.f32.mrf.mxu2 }
 0x210   :  { %v1256_v10 = vpop.f32.mrf.mxu3  ;;  %v1243_v11 = vadd.f32 %v2886_v55, %v1242_v30 }
 0x212   :  { %v1257_v17 = vadd.f32 %v1256_v10, %v1243_v11 }
 0x217   :  { %v1244_v2 = vpop.f32.mrf.mxu2 }
 0x218   :  { %v1245_v12 = vadd.f32 %v2886_v55, %v1244_v2  ;;  %v1258_v16 = vpop.f32.mrf.mxu3 }
 0x21a   :  { %v1259_v29 = vadd.f32 %v1258_v16, %v1245_v12  ;;  %v1746_v12 = vperm.slane %v4055_v22, 1 }
 0x21c   :  { %v1262_v7 = vpack.c.bf16 %v1259_v29, %v1257_v17 }
 0x21e   :  { %1336 = vmatmul.bf16.vlgmr.msra.gmra.mxu0 %v1262_v7 }
 0x21f   :  { %v1607_v49 = vpop.f32.mrf.mxu2 }
 0x220   :  { %v4061_v27 = vadd.f32 %v1607_v49, %v1516_v18  ;;  %v1621_v39 = vpop.f32.mrf.mxu3 }
 0x222   :  { %v1626_v21 = vrot.slane %v4061_v27, 4  ;;  %v1654_v23 = vmul.f32 %v4061_v27, %v4061_v27 }
 0x224   :  { %v1627_v24 = vadd.f32 %v1626_v21, %v4061_v27  ;;  %v1658_v25 = vrot.slane %v1654_v23, 4 }
 0x226   :  { %v1628_v28 = vrot.slane %v1627_v24, 2  ;;  %v1659_v32 = vadd.f32 %v1658_v25, %v1654_v23 }
 0x227   :  { %v1609_v33 = vpop.f32.mrf.mxu2 }
 0x228   :  { %v1629_v34 = vadd.f32 %v1628_v28, %v1627_v24  ;;  %v1660_v36 = vrot.slane %v1659_v32, 2  ;;  %v4073_v37 = vadd.f32 %v1609_v33, %v1516_v18  ;;  %v1750_v18 = vperm.slane %v1746_v12, 1 }
 0x229   :  { %v1760_v24 = vperm.slane %v1756_v19, 2 }
 0x22a   :  { %v1630_v50 = vrot.slane %v1629_v34, 1  ;;  %v1661_v31 = vadd.f32 %v1660_v36, %v1659_v32  ;;  %v1638_v40 = vrot.slane %v4073_v37, 4  ;;  %v1656_v41 = vmul.f32 %v4073_v37, %v4073_v37 }
 0x22c   :  { %v1631_v42 = vadd.f32 %v1630_v50, %v1629_v34  ;;  %v1662_v44 = vrot.slane %v1661_v31, 1  ;;  %v1639_v35 = vadd.f32 %v1638_v40, %v4073_v37  ;;  %v1670_v45 = vrot.slane %v1656_v41, 4 }
 0x22d   :  { %v1513_v50 = vperm.slane %v4055_v22, 4 }
 0x22e   :  { %v1650_v47 = vmul.f32 0.125, %v1631_v42  ;;  %v1663_v52 = vadd.f32 %v1662_v44, %v1661_v31  ;;  %v1640_v51 = vrot.slane %v1639_v35, 2  ;;  %v1671_v13 = vadd.f32 %v1670_v45, %v1656_v41  ;;  %v1623_v31 = vpop.f32.mrf.mxu3  ;;  %v2852_v42 = vld [vmem:[%s4233_s14 + $0x38] sm:$0xff] }
 0x22f   :  { %v1517_v40 = vperm.slane %v1513_v50, 0  ;;  %1479 = vmatpush.bf16.msra.mxu1 %v2852_v42 }
 0x230   :  { %v1682_v38 = vmul.f32 0.125, %v1663_v52  ;;  %v1686_v54 = vmul.f32 %v1650_v47, %v1650_v47  ;;  %v1641_v56 = vadd.f32 %v1640_v51, %v1639_v35  ;;  %v1672_v57 = vrot.slane %v1671_v13, 2 }
 0x231   :  { %v1694_v17 = vsub.f32 %v4061_v27, %v1650_v47  ;;  %v4099_v41 = vadd.f32 %v1623_v31, %v1517_v40  ;;  %v2851_v47 = vld [vmem:[%s4233_s14 + $0x30] sm:$0xff] }
 0x232   :  { %v1690_v58 = vsub.f32 %v1682_v38, %v1686_v54  ;;  %v1642_v59 = vrot.slane %v1641_v56, 1  ;;  %v1673_v60 = vadd.f32 %v1672_v57, %v1671_v13  ;;  %v2850_v54 = vld [vmem:[%s4233_s14 + $0x28] sm:$0xff] }
 0x233   :  { %v1644_v44 = vrot.slane %v4099_v41, 4  ;;  %v1657_v35 = vmul.f32 %v4099_v41, %v4099_v41  ;;  %1480 = vmatpush.bf16.msra.mxu1 %v2851_v47 }
 0x234   :  { %v1698_v62 = vadd.f32 1e-05, %v1690_v58  ;;  %v1643_v53 = vadd.f32 %v1642_v59, %v1641_v56  ;;  %v1674_v15 = vrot.slane %v1673_v60, 1 }
 0x235   :  { %v1645_v52 = vadd.f32 %v1644_v44, %v4099_v41  ;;  %v1676_v51 = vrot.slane %v1657_v35, 4 }
 0x236   :  { %2897 = vrsqrt.f32 %v1698_v62  ;;  %v1652_v63 = vmul.f32 0.125, %v1643_v53  ;;  %v1675_v0 = vadd.f32 %v1674_v15, %v1673_v60  ;;  %vm1708_vm13 = vweird.f32 %v1698_v62 }
 0x237   :  { %v1646_v56 = vrot.slane %v1645_v52, 2  ;;  %v1677_v57 = vadd.f32 %v1676_v51, %v1657_v35  ;;  %1481 = vmatpush.bf16.msra.mxu1 %v2850_v54  ;;  %v1279_v60 = vperm.slane %v4123_v43, 0 }
 0x238   :  { %v1688_v3 = vmul.f32 %v1652_v63, %v1652_v63  ;;  %v1684_v4 = vmul.f32 0.125, %v1675_v0  ;;  %v1696_v21 = vsub.f32 %v4073_v37, %v1652_v63  ;;  %v4101_v37 = vadd.f32 %v1621_v39, %v1517_v40  ;;  %v2884_v40 = vld [vmem:[%s4229_s10 + $0x78] sm:$0xff] }
 0x239   :  { %v1678_v53 = vrot.slane %v1677_v57, 2 }
 0x23a   :  { %v1692_v5 = vsub.f32 %v1684_v4, %v1688_v3  ;;  %v1632_v45 = vrot.slane %v4101_v37, 4  ;;  %v1655_v46 = vmul.f32 %v4101_v37, %v4101_v37  ;;  %v2848_v3 = vld [vmem:[%s4233_s14 + $0x18] sm:$0xff] }
 0x23b   :  { %1482 = vmatpush.bf16.msra.mxu1 %v2849_v61  ;;  %v2882_v61 = vld [vmem:[%s4229_s10 + $0x68] sm:$0xff] }
 0x23c   :  { %v2898_v6 = vpop.eup %2897  ;;  %v1700_v48 = vadd.f32 1e-05, %v1692_v5  ;;  %v1633_v13 = vadd.f32 %v1632_v45, %v4101_v37  ;;  %v1664_v38 = vrot.slane %v1655_v46, 4  ;;  %v1679_v5 = vadd.f32 %v1678_v53, %v1677_v57 }
 0x23d   :  { %v1703_v8 = vmul.f32 %v2898_v6, %v1698_v62  ;;  %vm1709_vm12 = vweird.f32 %v2898_v6  ;;  %v1647_v62 = vadd.f32 %v1646_v56, %v1645_v52  ;;  %v2883_v56 = vld [vmem:[%s4229_s10 + $0x70] sm:$0xff] }
 0x23e   :  { %2899 = vrsqrt.f32 %v1700_v48  ;;  %vm1710_vm14 = vmor %vm1708_vm13, %vm1709_vm12  ;;  %vm1728_vm0 = vweird.f32 %v1700_v48  ;;  %v1634_v58 = vrot.slane %v1633_v13, 2  ;;  %v1665_v59 = vadd.f32 %v1664_v38, %v1655_v46 }
 0x23f   :  { %v1704_v9 = vmul.f32 %v2898_v6, %v1703_v8  ;;  %v1648_v4 = vrot.slane %v1647_v62, 1  ;;  %1483 = vmatpush.bf16.msra.mxu1 %v2848_v3 }
 0x240   :  { %v1635_v15 = vadd.f32 %v1634_v58, %v1633_v13  ;;  %v1666_v63 = vrot.slane %v1665_v59, 2 }
 0x241   :  { %v1705_v30 = vmul.f32 0.5, %v1704_v9 }
 0x242   :  { %v1667_v9 = vadd.f32 %v1666_v63, %v1665_v59 }
 0x243   :  { %v1706_v10 = vsub.f32 1.5, %v1705_v30 }
 0x244   :  { %v2900_v55 = vpop.eup %2899 }
 0x245   :  { %v1707_v11 = vmul.f32 %v2898_v6, %v1706_v10  ;;  %v1723_v2 = vmul.f32 %v2900_v55, %v1700_v48  ;;  %vm1729_vm15 = vweird.f32 %v2900_v55  ;;  %v1636_v48 = vrot.slane %v1635_v15, 1 }
 0x246   :  { %vm1730_vm1 = vmor %vm1728_vm0, %vm1729_vm15 }
 0x247   :  { %v1711_v14 = vsel %vm1710_vm14, %v2898_v6, %v1707_v11  ;;  %v1724_v16 = vmul.f32 %v2900_v55, %v1723_v2  ;;  %v1649_v11 = vadd.f32 %v1648_v4, %v1647_v62  ;;  %v1680_v2 = vrot.slane %v1679_v5, 1 }
 0x248   :  { %v1742_v7 = vmul.f32 %v1711_v14, %v1694_v17  ;;  %v1668_v17 = vrot.slane %v1667_v9, 1 }
 0x249   :  { %v1725_v29 = vmul.f32 0.5, %v1724_v16  ;;  %v1637_v16 = vadd.f32 %v1636_v48, %v1635_v15 }
 0x24a   :  { %v1752_v23 = vmul.f32 %v1750_v18, %v1742_v7 }
 0x24b   :  { %v1726_v49 = vsub.f32 1.5, %v1725_v29 }
 0x24c   :  { %v1762_v32 = vadd.f32 %v1760_v24, %v1752_v23 }
 0x24d   :  { %v1727_v20 = vmul.f32 %v2900_v55, %v1726_v49  ;;  %v2846_v49 = vld [vmem:[%s4233_s14 + $0x8] sm:$0xff] }
 0x24e   :  { %v1766_v27 = vmax.f32 %v1762_v32, 0.0 }
 0x24f   :  { %v1731_v25 = vsel %vm1730_vm1, %v2900_v55, %v1727_v20  ;;  %v2847_v55 = vld [vmem:[%s4233_s14 + $0x10] sm:$0xff]  ;;  %v4146_v20 = vmul.f32 0.125, %v1649_v11 }
 0x250   :  { %v1744_v26 = vmul.f32 %v1731_v25, %v1696_v21  ;;  %1484 = vmatpush.bf16.msra.mxu1 %v2847_v55  ;;  %v1681_v21 = vadd.f32 %v1680_v2, %v1679_v5  ;;  %v2881_v5 = vld [vmem:[%s4229_s10 + $0x60] sm:$0xff]  ;;  %v2880_v55 = vld [vmem:[%s4229_s10 + $0x58] sm:$0xff] }
 0x251   :  { %v1689_v50 = vmul.f32 %v4146_v20, %v4146_v20 }
 0x252   :  { %v1754_v28 = vmul.f32 %v1750_v18, %v1744_v26  ;;  %v4149_v26 = vmul.f32 0.125, %v1637_v16  ;;  %v1685_v39 = vmul.f32 0.125, %v1681_v21  ;;  %v2878_v21 = vld [vmem:[%s4229_s10 + $0x48] sm:$0xff] }
 0x254   :  { %v1764_v33 = vadd.f32 %v1760_v24, %v1754_v28  ;;  %1485 = vmatpush.bf16.msra.mxu1 %v2846_v49  ;;  %v1669_v28 = vadd.f32 %v1668_v17, %v1667_v9  ;;  %v1687_v46 = vmul.f32 %v4149_v26, %v4149_v26  ;;  %v1693_v38 = vsub.f32 %v1685_v39, %v1689_v50 }
 0x255   :  { %v1402_v50 = vperm.slane %v4123_v43, 1 }
 0x256   :  { %v1768_v34 = vmax.f32 %v1764_v33, 0.0  ;;  %v1683_v45 = vmul.f32 0.125, %v1669_v28  ;;  %v4174_v15 = vadd.f32 1e-05, %v1693_v38 }
 0x258   :  { %v1770_v36 = vpack.c.bf16 %v1768_v34, %v1766_v27  ;;  %v1691_v59 = vsub.f32 %v1683_v45, %v1687_v46  ;;  %v1405_v46 = vperm.slane %v4123_v43, 2  ;;  %vm1738_vm10 = vweird.f32 %v4174_v15 }
 0x259   :  { %v1697_v43 = vsub.f32 %v4099_v41, %v4146_v20 }
 0x25a   :  { %1912 = vmatmul.bf16.vlgmr.msrb.gmra.mxu0 %v1770_v36  ;;  %v2845_v36 = vld [vmem:[%s4233_s14] sm:$0xff]  ;;  %v4176_v3 = vadd.f32 1e-05, %v1691_v59  ;;  %v1747_v59 = vperm.slane %v4055_v22, 5 }
 0x25b   :  { %1486 = vmatpush.bf16.msra.mxu1 %v2845_v36 }
 0x25c   :  { %vm1718_vm12 = vweird.f32 %v4176_v3 }
 0x25f   :  { %1918 = vmatpush.bf16.msrb.mxu1 %v2884_v40 }
 0x263   :  { %1919 = vmatpush.bf16.msrb.mxu1 %v2883_v56 }
 0x267   :  { %1920 = vmatpush.bf16.msrb.mxu1 %v2882_v61  ;;  %v1695_v61 = vsub.f32 %v4101_v37, %v4149_v26  ;;  %v2888_v37 = vld [vmem:[%s4234_s15] ss:$0 sm:$0xff] }
 0x26b   :  { %1921 = vmatpush.bf16.msrb.mxu1 %v2881_v5 }
 0x26f   :  { %1922 = vmatpush.bf16.msrb.mxu1 %v2880_v55 }
 0x29b   :  { %v1337_v0 = vpop.f32.mrf.mxu0 }
 0x29c   :  { %v4129_v1 = vadd.f32 %v1337_v0, %v1279_v60 }
 0x29e   :  { %v1342_v6 = vrot.slane %v4129_v1, 4  ;;  %v1356_v8 = vmul.f32 %v4129_v1, %v4129_v1 }
 0x2a0   :  { %v1343_v30 = vadd.f32 %v1342_v6, %v4129_v1  ;;  %v1358_v10 = vrot.slane %v1356_v8, 4 }
 0x2a2   :  { %v1344_v12 = vrot.slane %v1343_v30, 2  ;;  %v1359_v14 = vadd.f32 %v1358_v10, %v1356_v8 }
 0x2a3   :  { %v1339_v29 = vpop.f32.mrf.mxu0 }
 0x2a4   :  { %v1345_v7 = vadd.f32 %v1344_v12, %v1343_v30  ;;  %v1360_v18 = vrot.slane %v1359_v14, 2  ;;  %v4141_v19 = vadd.f32 %v1339_v29, %v1279_v60  ;;  %v2879_v12 = vld [vmem:[%s4229_s10 + $0x50] sm:$0xff] }
 0x2a5   :  { %1923 = vmatpush.bf16.msrb.mxu1 %v2879_v12 }
 0x2a6   :  { %v1346_v23 = vrot.slane %v1345_v7, 1  ;;  %v1361_v24 = vadd.f32 %v1360_v18, %v1359_v14  ;;  %v1348_v25 = vrot.slane %v4141_v19, 4  ;;  %v1357_v32 = vmul.f32 %v4141_v19, %v4141_v19 }
 0x2a8   :  { %v1347_v33 = vadd.f32 %v1346_v23, %v1345_v7  ;;  %v1362_v27 = vrot.slane %v1361_v24, 1  ;;  %v1349_v34 = vadd.f32 %v1348_v25, %v4141_v19  ;;  %v1364_v31 = vrot.slane %v1357_v32, 4  ;;  %v2877_v25 = vld [vmem:[%s4229_s10 + $0x40] sm:$0xff] }
 0x2a9   :  { %1924 = vmatpush.bf16.msrb.mxu1 %v2878_v21 }
 0x2aa   :  { %v4162_v42 = vmul.f32 0.125, %v1347_v33  ;;  %v1363_v44 = vadd.f32 %v1362_v27, %v1361_v24  ;;  %v1350_v35 = vrot.slane %v1349_v34, 2  ;;  %v1365_v47 = vadd.f32 %v1364_v31, %v1357_v32 }
 0x2ac   :  { %v1370_v52 = vmul.f32 0.125, %v1363_v44  ;;  %v1372_v51 = vmul.f32 %v4162_v42, %v4162_v42  ;;  %v1351_v13 = vadd.f32 %v1350_v35, %v1349_v34  ;;  %v1366_v54 = vrot.slane %v1365_v47, 2 }
 0x2ad   :  { %v1376_v27 = vsub.f32 %v4129_v1, %v4162_v42  ;;  %1925 = vmatpush.bf16.msrb.mxu1 %v2877_v25 }
 0x2ae   :  { %v1374_v57 = vsub.f32 %v1370_v52, %v1372_v51  ;;  %v1352_v58 = vrot.slane %v1351_v13, 1  ;;  %v1367_v60 = vadd.f32 %v1366_v54, %v1365_v47 }
 0x2b0   :  { %v1378_v62 = vadd.f32 1e-05, %v1374_v57  ;;  %v1353_v53 = vadd.f32 %v1352_v58, %v1351_v13  ;;  %v1368_v63 = vrot.slane %v1367_v60, 1 }
 0x2b2   :  { %2901 = vrsqrt.f32 %v1378_v62  ;;  %v1355_v0 = vmul.f32 0.125, %v1353_v53  ;;  %v1369_v4 = vadd.f32 %v1368_v63, %v1367_v60  ;;  %vm1386_vm3 = vweird.f32 %v1378_v62 }
 0x2b3   :  { %2903 = vrsqrt.f32 %v4174_v15  ;;  %v1751_v63 = vperm.slane %v1747_v59, 1 }
 0x2b4   :  { %v1373_v6 = vmul.f32 %v1355_v0, %v1355_v0  ;;  %v1371_v8 = vmul.f32 0.125, %v1369_v4  ;;  %2905 = vrsqrt.f32 %v4176_v3  ;;  %v1377_v47 = vsub.f32 %v4141_v19, %v1355_v0 }
 0x2b5   :  { %v1757_v0 = vperm.slane %v4055_v22, 6 }
 0x2b6   :  { %v1375_v48 = vsub.f32 %v1371_v8, %v1373_v6 }
 0x2b7   :  { %v1761_v5 = vperm.slane %v1757_v0, 2 }
 0x2b8   :  { %v2902_v9 = vpop.eup %2901  ;;  %v1379_v10 = vadd.f32 1e-05, %v1375_v48 }
 0x2b9   :  { %v1381_v30 = vmul.f32 %v2902_v9, %v1378_v62  ;;  %v2904_v11 = vpop.eup %2903  ;;  %vm1387_vm2 = vweird.f32 %v2902_v9 }
 0x2ba   :  { %2907 = vrsqrt.f32 %v1379_v10  ;;  %v2906_v14 = vpop.eup %2905  ;;  %v1733_v17 = vmul.f32 %v2904_v11, %v4174_v15  ;;  %vm1388_vm4 = vmor %vm1386_vm3, %vm1387_vm2  ;;  %vm1396_vm6 = vweird.f32 %v1379_v10  ;;  %vm1739_vm8 = vweird.f32 %v2904_v11 }
 0x2bb   :  { %v1382_v2 = vmul.f32 %v2902_v9, %v1381_v30  ;;  %v1713_v7 = vmul.f32 %v2906_v14, %v4176_v3  ;;  %vm1719_vm9 = vweird.f32 %v2906_v14  ;;  %vm1740_vm11 = vmor %vm1738_vm10, %vm1739_vm8 }
 0x2bc   :  { %v1734_v23 = vmul.f32 %v2904_v11, %v1733_v17  ;;  %vm1720_vm13 = vmor %vm1718_vm12, %vm1719_vm9 }
 0x2bd   :  { %v1383_v16 = vmul.f32 0.5, %v1382_v2  ;;  %v1714_v28 = vmul.f32 %v2906_v14, %v1713_v7 }
 0x2be   :  { %v1735_v34 = vmul.f32 0.5, %v1734_v23 }
 0x2bf   :  { %v1384_v29 = vsub.f32 1.5, %v1383_v16  ;;  %v1715_v31 = vmul.f32 0.5, %v1714_v28 }
 0x2c0   :  { %v2908_v18 = vpop.eup %2907  ;;  %v1736_v44 = vsub.f32 1.5, %v1735_v34 }
 0x2c1   :  { %v1385_v49 = vmul.f32 %v2902_v9, %v1384_v29  ;;  %v1391_v24 = vmul.f32 %v2908_v18, %v1379_v10  ;;  %vm1397_vm5 = vweird.f32 %v2908_v18  ;;  %v1716_v52 = vsub.f32 1.5, %v1715_v31 }
 0x2c2   :  { %vm1398_vm7 = vmor %vm1396_vm6, %vm1397_vm5  ;;  %v1737_v51 = vmul.f32 %v2904_v11, %v1736_v44 }
 0x2c3   :  { %v1389_v32 = vsel %vm1388_vm4, %v2902_v9, %v1385_v49  ;;  %v1392_v33 = vmul.f32 %v2908_v18, %v1391_v24  ;;  %v1717_v54 = vmul.f32 %v2906_v14, %v1716_v52  ;;  %vm1987_vm4 = vcmask 0  }
 0x2c4   :  { %v1400_v39 = vmul.f32 %v1389_v32, %v1376_v27  ;;  %v1741_v57 = vsel %vm1740_vm11, %v2904_v11, %v1737_v51  ;;  %v2887_v11 = vld [vmem:[%s4230_s11] ss:$0 sm:$0xff]  ;;  %s2939_s11 = smov [#allocation2]  }
 0x2c5   :  { %v1393_v36 = vmul.f32 0.5, %v1392_v33  ;;  %v1721_v60 = vsel %vm1720_vm13, %v2906_v14, %v1717_v54  ;;  %v1745_v62 = vmul.f32 %v1741_v57, %v1697_v43  ;;  %s1994_s15 = sshll.u32 %s2939_s11, 4  ;;  %s1995_s15 = int_to_ptr.vmem [resolvable:$true] %s1994_s15 }
 0x2c6   :  { %v1403_v45 = vmul.f32 %v1402_v50, %v1400_v39  ;;  %v1743_v15 = vmul.f32 %v1721_v60, %v1695_v61 }
 0x2c7   :  { %v1394_v40 = vsub.f32 1.5, %v1393_v36  ;;  %v1755_v3 = vmul.f32 %v1751_v63, %v1745_v62 }
 0x2c8   :  { %v1406_v13 = vadd.f32 %v1405_v46, %v1403_v45  ;;  %v1753_v4 = vmul.f32 %v1751_v63, %v1743_v15 }
 0x2c9   :  { %v1395_v35 = vmul.f32 %v2908_v18, %v1394_v40  ;;  %v1765_v6 = vadd.f32 %v1761_v5, %v1755_v3 }
 0x2ca   :  { %v1408_v19 = vmax.f32 %v1406_v13, 0.0  ;;  %v1763_v41 = vadd.f32 %v1761_v5, %v1753_v4 }
 0x2cb   :  { %v1399_v1 = vsel %vm1398_vm7, %v2908_v18, %v1395_v35  ;;  %v1769_v20 = vmax.f32 %v1765_v6, 0.0 }
 0x2cc   :  { %v1401_v42 = vmul.f32 %v1399_v1, %v1377_v47  ;;  %v1767_v8 = vmax.f32 %v1763_v41, 0.0 }
 0x2ce   :  { %v1404_v38 = vmul.f32 %v1402_v50, %v1401_v42  ;;  %v1771_v48 = vpack.c.bf16 %v1769_v20, %v1767_v8 }
 0x2d0   :  { %v1407_v56 = vadd.f32 %v1405_v46, %v1404_v38 }
 0x2d2   :  { %v1409_v58 = vmax.f32 %v1407_v56, 0.0 }
 0x2d4   :  { %v1410_v53 = vpack.c.bf16 %v1409_v58, %v1408_v19 }
 0x2d6   :  { %1487 = vmatmul.bf16.vlgmr.msra.gmra.mxu1 %v1410_v53 }
 0x2d7   :  { %v1913_v22 = vpop.f32.mrf.mxu0 }
 0x2d8   :  { %v1914_v12 = vadd.f32 %v2887_v11, %v1913_v22 }
 0x2df   :  { %v1915_v7 = vpop.f32.mrf.mxu0 }
 0x2e0   :  { %v1916_v18 = vadd.f32 %v2887_v11, %v1915_v7 }
 0x2e6   :  { %1926 = vmatmul.bf16.vlgmr.msrb.gmra.mxu1 %v1771_v48 }
 0x353   :  { %v1488_v26 = vpop.f32.mrf.mxu1 }
 0x354   :  { %v1489_v9 = vadd.f32 %v2888_v37, %v1488_v26 }
 0x356   :  { %v1938_v30 = vmul.f32 %v1489_v9, %v1489_v9 }
 0x358   :  { %1940 = vadd.xlane.f32.xlu0 %v1938_v30 }
 0x35b   :  { %v1490_v10 = vpop.f32.mrf.mxu1 }
 0x35c   :  { %v1491_v55 = vadd.f32 %v2888_v37, %v1490_v10 }
 0x35e   :  { %v1939_v2 = vmul.f32 %v1491_v55, %v1491_v55 }
 0x360   :  { %1942 = vadd.xlane.f32.xlu0 %v1939_v2 }
 0x363   :  { %v1927_v14 = vpop.f32.mrf.mxu1 }
 0x364   :  { %v1928_v16 = vadd.f32 %v1927_v14, %v1914_v12 }
 0x366   :  { %v1946_v17 = vmul.f32 %v1928_v16, %v1928_v16  ;;  %v1932_v29 = vmul.f32 %v1928_v16, %v1489_v9 }
 0x368   :  { %1948 = vadd.xlane.f32.xlu1 %v1946_v17  ;;  %1934 = vadd.xlane.f32.xlu2 %v1932_v29 }
 0x36b   :  { %v1929_v49 = vpop.f32.mrf.mxu1 }
 0x36c   :  { %v1930_v21 = vadd.f32 %v1929_v49, %v1916_v18 }
 0x36e   :  { %v1947_v23 = vmul.f32 %v1930_v21, %v1930_v21  ;;  %v1933_v24 = vmul.f32 %v1930_v21, %v1491_v55 }
 0x370   :  { %1950 = vadd.xlane.f32.xlu1 %v1947_v23  ;;  %1936 = vadd.xlane.f32.xlu2 %v1933_v24 }
 0x3cb   :  { %v1941_v25 = vpop.xlane.xlu0 %1940 }
 0x3cc   :  { %v1944_v32 = vmax.f32 %v1941_v25, 1e-16 }
 0x3d3   :  { %v1943_v34 = vpop.xlane.xlu0 %1942 }
 0x3d4   :  { %v1945_v39 = vmax.f32 %v1943_v34, 1e-16 }
 0x3db   :  { %v1949_v28 = vpop.xlane.xlu1 %1948  ;;  %v1935_v52 = vpop.xlane.xlu2 %1934 }
 0x3dc   :  { %v1952_v33 = vmax.f32 %v1949_v28, 1e-16 }
 0x3de   :  { %v1954_v27 = vmul.f32 %v1952_v33, %v1944_v32 }
 0x3e0   :  { %2909 = vrsqrt.f32 %v1954_v27  ;;  %vm1962_vm15 = vweird.f32 %v1954_v27 }
 0x3e3   :  { %v1951_v36 = vpop.xlane.xlu1 %1950  ;;  %v1937_v43 = vpop.xlane.xlu2 %1936 }
 0x3e4   :  { %v1953_v50 = vmax.f32 %v1951_v36, 1e-16 }
 0x3e6   :  { %v2910_v31 = vpop.eup %2909  ;;  %v1955_v40 = vmul.f32 %v1953_v50, %v1945_v39 }
 0x3e7   :  { %v1957_v44 = vmul.f32 %v2910_v31, %v1954_v27  ;;  %vm1963_vm14 = vweird.f32 %v2910_v31 }
 0x3e8   :  { %2911 = vrsqrt.f32 %v1955_v40  ;;  %vm1964_vm1 = vmor %vm1962_vm15, %vm1963_vm14  ;;  %vm1972_vm2 = vweird.f32 %v1955_v40 }
 0x3e9   :  { %v1958_v35 = vmul.f32 %v2910_v31, %v1957_v44 }
 0x3eb   :  { %v1959_v45 = vmul.f32 0.5, %v1958_v35 }
 0x3ed   :  { %v1960_v47 = vsub.f32 1.5, %v1959_v45 }
 0x3ee   :  { %v2912_v46 = vpop.eup %2911 }
 0x3ef   :  { %v1967_v1 = vmul.f32 %v2912_v46, %v1955_v40  ;;  %v1961_v51 = vmul.f32 %v2910_v31, %v1960_v47  ;;  %vm1973_vm0 = vweird.f32 %v2912_v46 }
 0x3f0   :  { %vm1974_vm3 = vmor %vm1972_vm2, %vm1973_vm0 }
 0x3f1   :  { %v1968_v42 = vmul.f32 %v2912_v46, %v1967_v1  ;;  %v1965_v54 = vsel %vm1964_vm1, %v2910_v31, %v1961_v51 }
 0x3f2   :  { %v1976_v19 = vmul.f32 %v1965_v54, %v1935_v52 }
 0x3f3   :  { %v1969_v13 = vmul.f32 0.5, %v1968_v42 }
 0x3f5   :  { %v1970_v38 = vsub.f32 1.5, %v1969_v13 }
 0x3f7   :  { %v1971_v56 = vmul.f32 %v2912_v46, %v1970_v38 }
 0x3f9   :  { %v1975_v57 = vsel %vm1974_vm3, %v2912_v46, %v1971_v56 }
 0x3fa   :  { %v1977_v58 = vmul.f32 %v1975_v57, %v1937_v43 }
 0x3fc   :  { %v1978_v59 = vadd.f32 %v1977_v58, %v1976_v19 }
 0x3fe   :  { %v1979_v60 = vrot.slane %v1978_v59, 4 }
 0x400   :  { %v1980_v61 = vadd.f32 %v1979_v60, %v1978_v59 }
 0x402   :  { %v1981_v62 = vrot.slane %v1980_v61, 2 }
 0x404   :  { %v1982_v53 = vadd.f32 %v1981_v62, %v1980_v61 }
 0x406   :  { %v1983_v15 = vrot.slane %v1982_v53, 1 }
 0x408   :  { %v1984_v63 = vadd.f32 %v1983_v15, %v1982_v53 }
 0x40a   :  { %v1985_v0 = vsub.f32 0.0, %v1984_v63 }
 0x40c   :  { %v1986_v3 = vmul.f32 0.0625, %v1985_v0 }
 0x40e   :  { %1988 = vst.msk [vmem:[#allocation2] sm:$0x1] %vm1987_vm4, %v1986_v3 }
 0x40f   :  { %1999 = dma.vmem_to_hbm [thread:$0]  %s1995_s15, 16, %s1997_s7, [#allocation3]  }
 0x410   :  { %2937 = dma.done.wait [#allocation3], 16  }
 0x411   :  { %2938 = vsyncadd [#allocation3], 4294967280 }
 0x412   :  { %2004 = vsyncpa [#allocation3], 1 }

</bundles_post_ra>
